<compile_context>
chip_gen: v7x
topology: tpu7x:2x2x1
jax: 0.10.0
libtpu: 0.0.40
codegen_flags: <defaults>
</compile_context>

<pallas_src>
import numpy as np
import jax
import jax.numpy as jnp
from jax import lax
from jax.experimental import pallas as pl
from jax.experimental.pallas import tpu as pltpu


# ----------------------------------------------------------------------------
# Fused kernel: conv1(3x3,pad1)+tanh+pool -> conv2+tanh+pool -> fc1+tanh -> fc2
# ----------------------------------------------------------------------------
def fused_net_kernel(x_ref, r1_ref, b1_ref, r2_ref, b2_ref,
                     w1f_ref, f1b_ref, f2w_ref, f2b_ref,
                     o_ref, pad1_ref, pad2_ref):
    # x_ref   : (B, 32, 96)        input rows, lane = w*3 + c
    # r1_ref  : (3, 96, 256)       conv1 Toeplitz weights [kh, K1, even|odd w-parity]
    # b1_ref  : (1, 128)           conv1 bias tiled over pooled w (lane = w*C1 + c)
    # r2_ref  : (2, 3, 128, 32)    conv2 Toeplitz weights [w_par, kh, K2, N2]
    # b2_ref  : (1, 32)
    # w1f_ref : (8, 32, 32)        fc1 weights, [h2, w2*C2 + c2, j]
    # f1b_ref : (1, 32), f2w_ref: (32, 2), f2b_ref: (1, 2)
    # o_ref   : (B, 2)
    # pad1_ref: (B, 48, 96)  VMEM  H-padded conv1 input (rows 8..39 = data)
    # pad2_ref: (B, 32, 128) VMEM  H-padded conv2 input (rows 8..23 = data)
    f32 = jnp.float32
    B, H1, K1 = x_ref.shape              # (2, 32, 96)
    N1 = r1_ref.shape[-1] // 2           # 128 = pooled_w1 * C1 (both parities packed)
    N2 = r2_ref.shape[-1]                # 32  = pooled_w2 * C2
    H1o = H1 // 2                        # 16
    H2o = H1 // 4                        # 8
    NF = f1b_ref.shape[-1]               # 32

    # ---- in-kernel zero padding (H only; W padding folded into Toeplitz R) ----
    pad1_ref[:, 0:8, :] = jnp.zeros((B, 8, K1), f32)
    pad1_ref[:, 8 + H1:16 + H1, :] = jnp.zeros((B, 8, K1), f32)
    pad1_ref[:, 8:8 + H1, :] = x_ref[...]

    # ---- conv1 + bias + tanh + 2x2 max-pool -----------------------------------
    # Both w parities live in the 256-lane N dim; h parities use 2 accumulators.
    acc_h0 = jnp.zeros((B * H1o, 2 * N1), f32)
    acc_h1 = jnp.zeros((B * H1o, 2 * N1), f32)
    for kh in range(3):
        r1k = r1_ref[kh]                                                  # (96, 256)
        p0 = pad1_ref[:, pl.ds(7 + kh, H1o, 2), :].reshape(B * H1o, K1)   # h_par = 0
        p1 = pad1_ref[:, pl.ds(8 + kh, H1o, 2), :].reshape(B * H1o, K1)   # h_par = 1
        acc_h0 = acc_h0 + jnp.dot(p0, r1k, preferred_element_type=f32)
        acc_h1 = acc_h1 + jnp.dot(p1, r1k, preferred_element_type=f32)
    pp1 = jnp.maximum(acc_h0, acc_h1)                    # (B*16, 256)
    pre1 = jnp.maximum(pp1[:, :N1], pp1[:, N1:])         # vreg-aligned halves -> (B*16, 128)
    act1 = jnp.tanh(pre1 + b1_ref[...])                  # pool-before-tanh is exact (monotone)
    # conv1_dropout: identity (eval mode)

    pad2_ref[:, 0:8, :] = jnp.zeros((B, 8, N1), f32)
    pad2_ref[:, 8 + H1o:16 + H1o, :] = jnp.zeros((B, 8, N1), f32)
    pad2_ref[:, 8:8 + H1o, :] = act1.reshape(B, H1o, N1)

    # ---- conv2 + bias + tanh + 2x2 max-pool -----------------------------------
    accs2 = [jnp.zeros((B * H2o, N2), f32) for _ in range(4)]   # idx = 2*h_par + w_par
    for kh in range(3):
        r2_e = r2_ref[0, kh]
        r2_o = r2_ref[1, kh]
        for h_par in range(2):
            piece = pad2_ref[:, pl.ds(7 + h_par + kh, H2o, 2), :].reshape(B * H2o, N1)
            accs2[2 * h_par + 0] = accs2[2 * h_par + 0] + jnp.dot(
                piece, r2_e, preferred_element_type=f32)
            accs2[2 * h_par + 1] = accs2[2 * h_par + 1] + jnp.dot(
                piece, r2_o, preferred_element_type=f32)
    pre2 = jnp.maximum(jnp.maximum(accs2[0], accs2[1]),
                       jnp.maximum(accs2[2], accs2[3]))
    act2 = jnp.tanh(pre2 + b2_ref[...])                  # (B*8, 32), lane = w*C2 + c
    # conv2_dropout: identity (eval mode)

    # ---- fc1 + tanh + fc2 (fc1 consumed per output row h2; no relayout) --------
    p2 = act2.reshape(B, H2o, N2)
    hid = jnp.zeros((B, NF), f32)
    for h2 in range(H2o):
        hid = hid + jnp.dot(p2[:, h2], w1f_ref[h2], preferred_element_type=f32)
    hid = jnp.tanh(hid + f1b_ref[...])
    out = jnp.dot(hid, f2w_ref[...], preferred_element_type=f32) + f2b_ref[...]
    o_ref[...] = out.astype(o_ref.dtype)


def _full_spec(a):
    nd = a.ndim
    return pl.BlockSpec(a.shape, lambda i, _nd=nd: (0,) * _nd)


def fused_forward(x_rows, kparams):
    r1, b1, r2, b2, w1f, f1b, f2w, f2b = kparams
    B, H, K1 = x_rows.shape
    N1 = r1.shape[-1] // 2
    n_out = f2w.shape[-1]
    args = (x_rows, r1, b1, r2, b2, w1f, f1b, f2w, f2b)
    return pl.pallas_call(
        fused_net_kernel,
        out_shape=jax.ShapeDtypeStruct((B, n_out), jnp.float32),
        grid=(1,),
        in_specs=[_full_spec(a) for a in args],
        out_specs=pl.BlockSpec((B, n_out), lambda i: (0, 0)),
        scratch_shapes=[
            pltpu.VMEM((B, H + 16, K1), jnp.float32),        # H-padded conv1 input
            pltpu.VMEM((B, H // 2 + 16, N1), jnp.float32),   # H-padded conv2 input
        ],
        compiler_params=pltpu.CompilerParams(
            dimension_semantics=("arbitrary",)),
    )(*args)


# ----------------------------------------------------------------------------
# One-time (outside the hot path) conversion of torch-convention weights into
# the kernel's layouts.
# ----------------------------------------------------------------------------
def _toeplitz_conv_weights(w_oihw, width, fuse_w_parities):
    """Row-Toeplitz conv weights with W-direction zero padding folded in.

    fuse_w_parities=False: (2, KH, width*Cin, (width//2)*Cout)      [w_par, kh, K, N]
    fuse_w_parities=True : (KH, width*Cin, 2*(width//2)*Cout)       even|odd packed in N
    """
    Cout, Cin, KH, KW = w_oihw.shape
    wp = width // 2
    wt = np.asarray(w_oihw, np.float32)
    r = np.zeros((2, KH, width * Cin, wp * Cout), np.float32)
    for w_par in range(2):
        for kh in range(KH):
            for wo in range(wp):
                for kw in range(KW):
                    w_in = 2 * wo + w_par + kw - 1
                    if 0 <= w_in < width:
                        r[w_par, kh,
                          w_in * Cin:(w_in + 1) * Cin,
                          wo * Cout:(wo + 1) * Cout] = wt[:, :, kh, kw].T
    if fuse_w_parities:
        return np.concatenate([r[0], r[1]], axis=-1)
    return r


def prepare_params(params, n_chans):
    c1w, c1b, c2w, c2b, f1w, f1b, f2w, f2b = [np.asarray(p, np.float32) for p in params]
    C1, C2 = n_chans, n_chans // 2
    n_hidden = f1w.shape[0]
    r1 = _toeplitz_conv_weights(c1w, 32, fuse_w_parities=True)    # (3,  96, 2*16*C1)
    r2 = _toeplitz_conv_weights(c2w, 16, fuse_w_parities=False)   # (2, 3, 16*C1, 8*C2)
    b1t = np.tile(c1b, 16)[None, :]                               # lane = w*C1 + c
    b2t = np.tile(c2b, 8)[None, :]                                # lane = w*C2 + c
    # fc1 weight: torch feature order (c2, h2, w2) -> [h2, w2*C2 + c2, j]
    w1f = f1w.reshape(n_hidden, C2, 8, 8).transpose(2, 3, 1, 0).reshape(8, 8 * C2, n_hidden)
    kp = (r1, b1t, r2, b2t, w1f, f1b[None, :], f2w.T.copy(), f2b[None, :])
    return tuple(jnp.asarray(a) for a in kp)


def net_dropout_forward(x_nchw, kparams):
    # Single small layout op left in the hot path: NCHW -> (B, H, W*Cin) rows
    # (lane index = w*Cin + c), matching the kernel's Toeplitz lane layout.
    B, C, H, W = x_nchw.shape
    x_rows = jnp.transpose(x_nchw, (0, 2, 3, 1)).reshape(B, H, W * C)
    return fused_forward(x_rows, kparams)


# ----------------------------------------------------------------------------
# Pure-JAX reference (torch semantics) for correctness checking.
# ----------------------------------------------------------------------------
def reference_forward(x_nchw, params):
    (c1w, c1b, c2w, c2b, f1w, f1b, f2w, f2b) = params

    def conv(x, w, b):
        y = lax.conv_general_dilated(
            x, w, (1, 1), [(1, 1), (1, 1)],
            dimension_numbers=("NCHW", "OIHW", "NCHW"))
        return y + b[None, :, None, None]

    def pool(x):
        return lax.reduce_window(x, -jnp.inf, lax.max,
                                 (1, 1, 2, 2), (1, 1, 2, 2), "VALID")

    o = pool(jnp.tanh(conv(x_nchw, c1w, c1b)))
    o = pool(jnp.tanh(conv(o, c2w, c2b)))
    o = o.reshape(o.shape[0], -1)
    o = jnp.tanh(o @ f1w.T + f1b)
    return o @ f2w.T + f2b


if __name__ == "__main__":
    # Small config consistent with the module: n_chans=8 -> conv1: 3->8,
    # conv2: 8->4, fc1 in-features = 8*8*4 = 256. Spatial must be 32x32.
    n_chans = 8
    C1, C2 = n_chans, n_chans // 2

    key = jax.random.PRNGKey(0)
    ks = jax.random.split(key, 9)
    params = (
        0.1 * jax.random.normal(ks[0], (C1, 3, 3, 3), jnp.float32),     # conv1 W (OIHW)
        0.1 * jax.random.normal(ks[1], (C1,), jnp.float32),             # conv1 b
        0.1 * jax.random.normal(ks[2], (C2, C1, 3, 3), jnp.float32),    # conv2 W (OIHW)
        0.1 * jax.random.normal(ks[3], (C2,), jnp.float32),             # conv2 b
        0.1 * jax.random.normal(ks[4], (32, 8 * 8 * C2), jnp.float32),  # fc1 W
        0.1 * jax.random.normal(ks[5], (32,), jnp.float32),             # fc1 b
        0.1 * jax.random.normal(ks[6], (2, 32), jnp.float32),           # fc2 W
        0.1 * jax.random.normal(ks[7], (2,), jnp.float32),              # fc2 b
    )
    x = jax.random.normal(ks[8], (2, 3, 32, 32), jnp.float32)           # NCHW like PyTorch

    kparams = prepare_params(params, n_chans)                           # once, off hot path
    out = jax.jit(net_dropout_forward)(x, kparams)
    out = jax.block_until_ready(out)

    ref = reference_forward(x, params)
    assert out.shape == (2, 2), out.shape
    max_err = float(jnp.max(jnp.abs(out - ref)))
    assert max_err < 5e-3, f"max abs error too large: {max_err}"

    print("KERNEL_OK")
</pallas_src>

<mosaic_0001>
module attributes {stable_mosaic.version = 11 : i64} {
  func.func @fused_net_kernel(%arg0: i32, %arg1: memref<2x32x96xf32, #tpu.memory_space<vmem>>, %arg2: memref<3x96x256xf32, #tpu.memory_space<vmem>>, %arg3: memref<1x128xf32, #tpu.memory_space<vmem>>, %arg4: memref<2x3x128x32xf32, #tpu.memory_space<vmem>>, %arg5: memref<1x32xf32, #tpu.memory_space<vmem>>, %arg6: memref<8x32x32xf32, #tpu.memory_space<vmem>>, %arg7: memref<1x32xf32, #tpu.memory_space<vmem>>, %arg8: memref<32x2xf32, #tpu.memory_space<vmem>>, %arg9: memref<1x2xf32, #tpu.memory_space<vmem>>, %arg10: memref<2x2xf32, #tpu.memory_space<vmem>>, %arg11: memref<2x48x96xf32, #tpu.memory_space<vmem>>, %arg12: memref<2x32x128xf32, #tpu.memory_space<vmem>>) attributes {dimension_semantics = [#tpu.dimension_semantics<arbitrary>], iteration_bounds = array<i64: 1>, scalar_prefetch = 0 : i64, scratch_operands = 2 : i64, tpu.core_type = #tpu.core_type<tc>, window_params = [{pipeline_mode = #tpu.pipeline_mode<synchronous>, transform_indices = @transform_0, window_bounds = array<i64: 2, 32, 96>}, {pipeline_mode = #tpu.pipeline_mode<synchronous>, transform_indices = @transform_1, window_bounds = array<i64: 3, 96, 256>}, {pipeline_mode = #tpu.pipeline_mode<synchronous>, transform_indices = @transform_2, window_bounds = array<i64: 1, 128>}, {pipeline_mode = #tpu.pipeline_mode<synchronous>, transform_indices = @transform_3, window_bounds = array<i64: 2, 3, 128, 32>}, {pipeline_mode = #tpu.pipeline_mode<synchronous>, transform_indices = @transform_4, window_bounds = array<i64: 1, 32>}, {pipeline_mode = #tpu.pipeline_mode<synchronous>, transform_indices = @transform_5, window_bounds = array<i64: 8, 32, 32>}, {pipeline_mode = #tpu.pipeline_mode<synchronous>, transform_indices = @transform_6, window_bounds = array<i64: 1, 32>}, {pipeline_mode = #tpu.pipeline_mode<synchronous>, transform_indices = @transform_7, window_bounds = array<i64: 32, 2>}, {pipeline_mode = #tpu.pipeline_mode<synchronous>, transform_indices = @transform_8, window_bounds = array<i64: 1, 2>}, {pipeline_mode = #tpu.pipeline_mode<synchronous>, transform_indices = @transform_9, window_bounds = array<i64: 2, 2>}]} {
    %cst = arith.constant 0.000000e+00 : f32
    %0 = vector.broadcast %cst : f32 to vector<2x8x96xf32>
    %c0 = arith.constant 0 : index
    %c0_0 = arith.constant 0 : index
    %c0_1 = arith.constant 0 : index
    %1 = vector.load %arg11[%c0, %c0_0, %c0_1] : memref<2x48x96xf32, #tpu.memory_space<vmem>>, vector<2x8x96xf32>
    tpu.vector_store %arg11[%c0, %c0_0, %c0_1], %0 {strides = array<i32>} : memref<2x48x96xf32, #tpu.memory_space<vmem>>, vector<2x8x96xf32>,
    %cst_2 = arith.constant 0.000000e+00 : f32
    %2 = vector.broadcast %cst_2 : f32 to vector<2x8x96xf32>
    %c0_3 = arith.constant 0 : index
    %c40 = arith.constant 40 : index
    %c0_4 = arith.constant 0 : index
    %3 = vector.load %arg11[%c0_3, %c40, %c0_4] : memref<2x48x96xf32, #tpu.memory_space<vmem>>, vector<2x8x96xf32>
    tpu.vector_store %arg11[%c0_3, %c40, %c0_4], %2 {strides = array<i32>} : memref<2x48x96xf32, #tpu.memory_space<vmem>>, vector<2x8x96xf32>,
    %c0_5 = arith.constant 0 : index
    %c0_6 = arith.constant 0 : index
    %c0_7 = arith.constant 0 : index
    %4 = vector.load %arg1[%c0_5, %c0_6, %c0_7] : memref<2x32x96xf32, #tpu.memory_space<vmem>>, vector<2x32x96xf32>
    %c0_8 = arith.constant 0 : index
    %c8 = arith.constant 8 : index
    %c0_9 = arith.constant 0 : index
    %5 = vector.load %arg11[%c0_8, %c8, %c0_9] : memref<2x48x96xf32, #tpu.memory_space<vmem>>, vector<2x32x96xf32>
    tpu.vector_store %arg11[%c0_8, %c8, %c0_9], %4 {strides = array<i32>} : memref<2x48x96xf32, #tpu.memory_space<vmem>>, vector<2x32x96xf32>,
    %cst_10 = arith.constant 0.000000e+00 : f32
    %6 = vector.broadcast %cst_10 : f32 to vector<32x256xf32>
    %cst_11 = arith.constant 0.000000e+00 : f32
    %7 = vector.broadcast %cst_11 : f32 to vector<32x256xf32>
    %c0_12 = arith.constant 0 : index
    %c0_13 = arith.constant 0 : index
    %c0_14 = arith.constant 0 : index
    %8 = vector.load %arg2[%c0_12, %c0_13, %c0_14] : memref<3x96x256xf32, #tpu.memory_space<vmem>>, vector<1x96x256xf32>
    %9 = vector.shape_cast %8 : vector<1x96x256xf32> to vector<96x256xf32>
    %c0_15 = arith.constant 0 : index
    %c7 = arith.constant 7 : index
    %c0_16 = arith.constant 0 : index
    %10 = tpu.strided_load %arg11[%c0_15, %c7, %c0_16] {strides = array<i32: 1, 2, 1>} : memref<2x48x96xf32, #tpu.memory_space<vmem>>, vector<2x16x96xf32>
    %11 = vector.shape_cast %10 : vector<2x16x96xf32> to vector<32x96xf32>
    %c0_17 = arith.constant 0 : index
    %c8_18 = arith.constant 8 : index
    %c0_19 = arith.constant 0 : index
    %12 = tpu.strided_load %arg11[%c0_17, %c8_18, %c0_19] {strides = array<i32: 1, 2, 1>} : memref<2x48x96xf32, #tpu.memory_space<vmem>>, vector<2x16x96xf32>
    %13 = vector.shape_cast %12 : vector<2x16x96xf32> to vector<32x96xf32>
    %cst_20 = arith.constant dense<0.000000e+00> : vector<32x256xf32>
    %14 = tpu.matmul %11, %9, %cst_20 {dimension_numbers = #tpu.dot_dimension_numbers<[1], [0], [0], [1], [0, 0, 1, 1], [], []>} : vector<32x96xf32>, vector<96x256xf32>, vector<32x256xf32> -> vector<32x256xf32>
    %15 = arith.addf %6, %14 : vector<32x256xf32>
    %cst_21 = arith.constant dense<0.000000e+00> : vector<32x256xf32>
    %16 = tpu.matmul %13, %9, %cst_21 {dimension_numbers = #tpu.dot_dimension_numbers<[1], [0], [0], [1], [0, 0, 1, 1], [], []>} : vector<32x96xf32>, vector<96x256xf32>, vector<32x256xf32> -> vector<32x256xf32>
    %17 = arith.addf %7, %16 : vector<32x256xf32>
    %c1 = arith.constant 1 : index
    %c0_22 = arith.constant 0 : index
    %c0_23 = arith.constant 0 : index
    %18 = vector.load %arg2[%c1, %c0_22, %c0_23] : memref<3x96x256xf32, #tpu.memory_space<vmem>>, vector<1x96x256xf32>
    %19 = vector.shape_cast %18 : vector<1x96x256xf32> to vector<96x256xf32>
    %c0_24 = arith.constant 0 : index
    %c8_25 = arith.constant 8 : index
    %c0_26 = arith.constant 0 : index
    %20 = tpu.strided_load %arg11[%c0_24, %c8_25, %c0_26] {strides = array<i32: 1, 2, 1>} : memref<2x48x96xf32, #tpu.memory_space<vmem>>, vector<2x16x96xf32>
    %21 = vector.shape_cast %20 : vector<2x16x96xf32> to vector<32x96xf32>
    %c0_27 = arith.constant 0 : index
    %c9 = arith.constant 9 : index
    %c0_28 = arith.constant 0 : index
    %22 = tpu.strided_load %arg11[%c0_27, %c9, %c0_28] {strides = array<i32: 1, 2, 1>} : memref<2x48x96xf32, #tpu.memory_space<vmem>>, vector<2x16x96xf32>
    %23 = vector.shape_cast %22 : vector<2x16x96xf32> to vector<32x96xf32>
    %cst_29 = arith.constant dense<0.000000e+00> : vector<32x256xf32>
    %24 = tpu.matmul %21, %19, %cst_29 {dimension_numbers = #tpu.dot_dimension_numbers<[1], [0], [0], [1], [0, 0, 1, 1], [], []>} : vector<32x96xf32>, vector<96x256xf32>, vector<32x256xf32> -> vector<32x256xf32>
    %25 = arith.addf %15, %24 : vector<32x256xf32>
    %cst_30 = arith.constant dense<0.000000e+00> : vector<32x256xf32>
    %26 = tpu.matmul %23, %19, %cst_30 {dimension_numbers = #tpu.dot_dimension_numbers<[1], [0], [0], [1], [0, 0, 1, 1], [], []>} : vector<32x96xf32>, vector<96x256xf32>, vector<32x256xf32> -> vector<32x256xf32>
    %27 = arith.addf %17, %26 : vector<32x256xf32>
    %c2 = arith.constant 2 : index
    %c0_31 = arith.constant 0 : index
    %c0_32 = arith.constant 0 : index
    %28 = vector.load %arg2[%c2, %c0_31, %c0_32] : memref<3x96x256xf32, #tpu.memory_space<vmem>>, vector<1x96x256xf32>
    %29 = vector.shape_cast %28 : vector<1x96x256xf32> to vector<96x256xf32>
    %c0_33 = arith.constant 0 : index
    %c9_34 = arith.constant 9 : index
    %c0_35 = arith.constant 0 : index
    %30 = tpu.strided_load %arg11[%c0_33, %c9_34, %c0_35] {strides = array<i32: 1, 2, 1>} : memref<2x48x96xf32, #tpu.memory_space<vmem>>, vector<2x16x96xf32>
    %31 = vector.shape_cast %30 : vector<2x16x96xf32> to vector<32x96xf32>
    %c0_36 = arith.constant 0 : index
    %c10 = arith.constant 10 : index
    %c0_37 = arith.constant 0 : index
    %32 = tpu.strided_load %arg11[%c0_36, %c10, %c0_37] {strides = array<i32: 1, 2, 1>} : memref<2x48x96xf32, #tpu.memory_space<vmem>>, vector<2x16x96xf32>
    %33 = vector.shape_cast %32 : vector<2x16x96xf32> to vector<32x96xf32>
    %cst_38 = arith.constant dense<0.000000e+00> : vector<32x256xf32>
    %34 = tpu.matmul %31, %29, %cst_38 {dimension_numbers = #tpu.dot_dimension_numbers<[1], [0], [0], [1], [0, 0, 1, 1], [], []>} : vector<32x96xf32>, vector<96x256xf32>, vector<32x256xf32> -> vector<32x256xf32>
    %35 = arith.addf %25, %34 : vector<32x256xf32>
    %cst_39 = arith.constant dense<0.000000e+00> : vector<32x256xf32>
    %36 = tpu.matmul %33, %29, %cst_39 {dimension_numbers = #tpu.dot_dimension_numbers<[1], [0], [0], [1], [0, 0, 1, 1], [], []>} : vector<32x96xf32>, vector<96x256xf32>, vector<32x256xf32> -> vector<32x256xf32>
    %37 = arith.addf %27, %36 : vector<32x256xf32>
    %38 = arith.maximumf %35, %37 : vector<32x256xf32>
    %39 = vector.extract_strided_slice %38 {offsets = [0, 0], sizes = [32, 128], strides = [1, 1]} : vector<32x256xf32> to vector<32x128xf32>
    %40 = vector.extract_strided_slice %38 {offsets = [0, 128], sizes = [32, 128], strides = [1, 1]} : vector<32x256xf32> to vector<32x128xf32>
    %41 = arith.maximumf %39, %40 : vector<32x128xf32>
    %c0_40 = arith.constant 0 : index
    %c0_41 = arith.constant 0 : index
    %42 = vector.load %arg3[%c0_40, %c0_41] : memref<1x128xf32, #tpu.memory_space<vmem>>, vector<1x128xf32>
    %43 = vector.broadcast %42 : vector<1x128xf32> to vector<32x128xf32>
    %44 = arith.addf %41, %43 : vector<32x128xf32>
    %45 = math.tanh %44 : vector<32x128xf32>
    %cst_42 = arith.constant 0.000000e+00 : f32
    %46 = vector.broadcast %cst_42 : f32 to vector<2x8x128xf32>
    %c0_43 = arith.constant 0 : index
    %c0_44 = arith.constant 0 : index
    %c0_45 = arith.constant 0 : index
    %47 = vector.load %arg12[%c0_43, %c0_44, %c0_45] : memref<2x32x128xf32, #tpu.memory_space<vmem>>, vector<2x8x128xf32>
    tpu.vector_store %arg12[%c0_43, %c0_44, %c0_45], %46 {strides = array<i32>} : memref<2x32x128xf32, #tpu.memory_space<vmem>>, vector<2x8x128xf32>,
    %cst_46 = arith.constant 0.000000e+00 : f32
    %48 = vector.broadcast %cst_46 : f32 to vector<2x8x128xf32>
    %c0_47 = arith.constant 0 : index
    %c24 = arith.constant 24 : index
    %c0_48 = arith.constant 0 : index
    %49 = vector.load %arg12[%c0_47, %c24, %c0_48] : memref<2x32x128xf32, #tpu.memory_space<vmem>>, vector<2x8x128xf32>
    tpu.vector_store %arg12[%c0_47, %c24, %c0_48], %48 {strides = array<i32>} : memref<2x32x128xf32, #tpu.memory_space<vmem>>, vector<2x8x128xf32>,
    %50 = vector.shape_cast %45 : vector<32x128xf32> to vector<2x16x128xf32>
    %c0_49 = arith.constant 0 : index
    %c8_50 = arith.constant 8 : index
    %c0_51 = arith.constant 0 : index
    %51 = vector.load %arg12[%c0_49, %c8_50, %c0_51] : memref<2x32x128xf32, #tpu.memory_space<vmem>>, vector<2x16x128xf32>
    tpu.vector_store %arg12[%c0_49, %c8_50, %c0_51], %50 {strides = array<i32>} : memref<2x32x128xf32, #tpu.memory_space<vmem>>, vector<2x16x128xf32>,
    %cst_52 = arith.constant 0.000000e+00 : f32
    %52 = vector.broadcast %cst_52 : f32 to vector<16x32xf32>
    %cst_53 = arith.constant 0.000000e+00 : f32
    %53 = vector.broadcast %cst_53 : f32 to vector<16x32xf32>
    %cst_54 = arith.constant 0.000000e+00 : f32
    %54 = vector.broadcast %cst_54 : f32 to vector<16x32xf32>
    %cst_55 = arith.constant 0.000000e+00 : f32
    %55 = vector.broadcast %cst_55 : f32 to vector<16x32xf32>
    %c0_56 = arith.constant 0 : index
    %c0_57 = arith.constant 0 : index
    %c0_58 = arith.constant 0 : index
    %c0_59 = arith.constant 0 : index
    %56 = vector.load %arg4[%c0_56, %c0_57, %c0_58, %c0_59] : memref<2x3x128x32xf32, #tpu.memory_space<vmem>>, vector<1x1x128x32xf32>
    %57 = vector.shape_cast %56 : vector<1x1x128x32xf32> to vector<128x32xf32>
    %c1_60 = arith.constant 1 : index
    %c0_61 = arith.constant 0 : index
    %c0_62 = arith.constant 0 : index
    %c0_63 = arith.constant 0 : index
    %58 = vector.load %arg4[%c1_60, %c0_61, %c0_62, %c0_63] : memref<2x3x128x32xf32, #tpu.memory_space<vmem>>, vector<1x1x128x32xf32>
    %59 = vector.shape_cast %58 : vector<1x1x128x32xf32> to vector<128x32xf32>
    %c0_64 = arith.constant 0 : index
    %c7_65 = arith.constant 7 : index
    %c0_66 = arith.constant 0 : index
    %60 = tpu.strided_load %arg12[%c0_64, %c7_65, %c0_66] {strides = array<i32: 1, 2, 1>} : memref<2x32x128xf32, #tpu.memory_space<vmem>>, vector<2x8x128xf32>
    %61 = vector.shape_cast %60 : vector<2x8x128xf32> to vector<16x128xf32>
    %cst_67 = arith.constant dense<0.000000e+00> : vector<16x32xf32>
    %62 = tpu.matmul %61, %57, %cst_67 {dimension_numbers = #tpu.dot_dimension_numbers<[1], [0], [0], [1], [0, 0, 1, 1], [], []>} : vector<16x128xf32>, vector<128x32xf32>, vector<16x32xf32> -> vector<16x32xf32>
    %63 = arith.addf %52, %62 : vector<16x32xf32>
    %cst_68 = arith.constant dense<0.000000e+00> : vector<16x32xf32>
    %64 = tpu.matmul %61, %59, %cst_68 {dimension_numbers = #tpu.dot_dimension_numbers<[1], [0], [0], [1], [0, 0, 1, 1], [], []>} : vector<16x128xf32>, vector<128x32xf32>, vector<16x32xf32> -> vector<16x32xf32>
    %65 = arith.addf %53, %64 : vector<16x32xf32>
    %c0_69 = arith.constant 0 : index
    %c8_70 = arith.constant 8 : index
    %c0_71 = arith.constant 0 : index
    %66 = tpu.strided_load %arg12[%c0_69, %c8_70, %c0_71] {strides = array<i32: 1, 2, 1>} : memref<2x32x128xf32, #tpu.memory_space<vmem>>, vector<2x8x128xf32>
    %67 = vector.shape_cast %66 : vector<2x8x128xf32> to vector<16x128xf32>
    %cst_72 = arith.constant dense<0.000000e+00> : vector<16x32xf32>
    %68 = tpu.matmul %67, %57, %cst_72 {dimension_numbers = #tpu.dot_dimension_numbers<[1], [0], [0], [1], [0, 0, 1, 1], [], []>} : vector<16x128xf32>, vector<128x32xf32>, vector<16x32xf32> -> vector<16x32xf32>
    %69 = arith.addf %54, %68 : vector<16x32xf32>
    %cst_73 = arith.constant dense<0.000000e+00> : vector<16x32xf32>
    %70 = tpu.matmul %67, %59, %cst_73 {dimension_numbers = #tpu.dot_dimension_numbers<[1], [0], [0], [1], [0, 0, 1, 1], [], []>} : vector<16x128xf32>, vector<128x32xf32>, vector<16x32xf32> -> vector<16x32xf32>
    %71 = arith.addf %55, %70 : vector<16x32xf32>
    %c0_74 = arith.constant 0 : index
    %c1_75 = arith.constant 1 : index
    %c0_76 = arith.constant 0 : index
    %c0_77 = arith.constant 0 : index
    %72 = vector.load %arg4[%c0_74, %c1_75, %c0_76, %c0_77] : memref<2x3x128x32xf32, #tpu.memory_space<vmem>>, vector<1x1x128x32xf32>
    %73 = vector.shape_cast %72 : vector<1x1x128x32xf32> to vector<128x32xf32>
    %c1_78 = arith.constant 1 : index
    %c1_79 = arith.constant 1 : index
    %c0_80 = arith.constant 0 : index
    %c0_81 = arith.constant 0 : index
    %74 = vector.load %arg4[%c1_78, %c1_79, %c0_80, %c0_81] : memref<2x3x128x32xf32, #tpu.memory_space<vmem>>, vector<1x1x128x32xf32>
    %75 = vector.shape_cast %74 : vector<1x1x128x32xf32> to vector<128x32xf32>
    %c0_82 = arith.constant 0 : index
    %c8_83 = arith.constant 8 : index
    %c0_84 = arith.constant 0 : index
    %76 = tpu.strided_load %arg12[%c0_82, %c8_83, %c0_84] {strides = array<i32: 1, 2, 1>} : memref<2x32x128xf32, #tpu.memory_space<vmem>>, vector<2x8x128xf32>
    %77 = vector.shape_cast %76 : vector<2x8x128xf32> to vector<16x128xf32>
    %cst_85 = arith.constant dense<0.000000e+00> : vector<16x32xf32>
    %78 = tpu.matmul %77, %73, %cst_85 {dimension_numbers = #tpu.dot_dimension_numbers<[1], [0], [0], [1], [0, 0, 1, 1], [], []>} : vector<16x128xf32>, vector<128x32xf32>, vector<16x32xf32> -> vector<16x32xf32>
    %79 = arith.addf %63, %78 : vector<16x32xf32>
    %cst_86 = arith.constant dense<0.000000e+00> : vector<16x32xf32>
    %80 = tpu.matmul %77, %75, %cst_86 {dimension_numbers = #tpu.dot_dimension_numbers<[1], [0], [0], [1], [0, 0, 1, 1], [], []>} : vector<16x128xf32>, vector<128x32xf32>, vector<16x32xf32> -> vector<16x32xf32>
    %81 = arith.addf %65, %80 : vector<16x32xf32>
    %c0_87 = arith.constant 0 : index
    %c9_88 = arith.constant 9 : index
    %c0_89 = arith.constant 0 : index
    %82 = tpu.strided_load %arg12[%c0_87, %c9_88, %c0_89] {strides = array<i32: 1, 2, 1>} : memref<2x32x128xf32, #tpu.memory_space<vmem>>, vector<2x8x128xf32>
    %83 = vector.shape_cast %82 : vector<2x8x128xf32> to vector<16x128xf32>
    %cst_90 = arith.constant dense<0.000000e+00> : vector<16x32xf32>
    %84 = tpu.matmul %83, %73, %cst_90 {dimension_numbers = #tpu.dot_dimension_numbers<[1], [0], [0], [1], [0, 0, 1, 1], [], []>} : vector<16x128xf32>, vector<128x32xf32>, vector<16x32xf32> -> vector<16x32xf32>
    %85 = arith.addf %69, %84 : vector<16x32xf32>
    %cst_91 = arith.constant dense<0.000000e+00> : vector<16x32xf32>
    %86 = tpu.matmul %83, %75, %cst_91 {dimension_numbers = #tpu.dot_dimension_numbers<[1], [0], [0], [1], [0, 0, 1, 1], [], []>} : vector<16x128xf32>, vector<128x32xf32>, vector<16x32xf32> -> vector<16x32xf32>
    %87 = arith.addf %71, %86 : vector<16x32xf32>
    %c0_92 = arith.constant 0 : index
    %c2_93 = arith.constant 2 : index
    %c0_94 = arith.constant 0 : index
    %c0_95 = arith.constant 0 : index
    %88 = vector.load %arg4[%c0_92, %c2_93, %c0_94, %c0_95] : memref<2x3x128x32xf32, #tpu.memory_space<vmem>>, vector<1x1x128x32xf32>
    %89 = vector.shape_cast %88 : vector<1x1x128x32xf32> to vector<128x32xf32>
    %c1_96 = arith.constant 1 : index
    %c2_97 = arith.constant 2 : index
    %c0_98 = arith.constant 0 : index
    %c0_99 = arith.constant 0 : index
    %90 = vector.load %arg4[%c1_96, %c2_97, %c0_98, %c0_99] : memref<2x3x128x32xf32, #tpu.memory_space<vmem>>, vector<1x1x128x32xf32>
    %91 = vector.shape_cast %90 : vector<1x1x128x32xf32> to vector<128x32xf32>
    %c0_100 = arith.constant 0 : index
    %c9_101 = arith.constant 9 : index
    %c0_102 = arith.constant 0 : index
    %92 = tpu.strided_load %arg12[%c0_100, %c9_101, %c0_102] {strides = array<i32: 1, 2, 1>} : memref<2x32x128xf32, #tpu.memory_space<vmem>>, vector<2x8x128xf32>
    %93 = vector.shape_cast %92 : vector<2x8x128xf32> to vector<16x128xf32>
    %cst_103 = arith.constant dense<0.000000e+00> : vector<16x32xf32>
    %94 = tpu.matmul %93, %89, %cst_103 {dimension_numbers = #tpu.dot_dimension_numbers<[1], [0], [0], [1], [0, 0, 1, 1], [], []>} : vector<16x128xf32>, vector<128x32xf32>, vector<16x32xf32> -> vector<16x32xf32>
    %95 = arith.addf %79, %94 : vector<16x32xf32>
    %cst_104 = arith.constant dense<0.000000e+00> : vector<16x32xf32>
    %96 = tpu.matmul %93, %91, %cst_104 {dimension_numbers = #tpu.dot_dimension_numbers<[1], [0], [0], [1], [0, 0, 1, 1], [], []>} : vector<16x128xf32>, vector<128x32xf32>, vector<16x32xf32> -> vector<16x32xf32>
    %97 = arith.addf %81, %96 : vector<16x32xf32>
    %c0_105 = arith.constant 0 : index
    %c10_106 = arith.constant 10 : index
    %c0_107 = arith.constant 0 : index
    %98 = tpu.strided_load %arg12[%c0_105, %c10_106, %c0_107] {strides = array<i32: 1, 2, 1>} : memref<2x32x128xf32, #tpu.memory_space<vmem>>, vector<2x8x128xf32>
    %99 = vector.shape_cast %98 : vector<2x8x128xf32> to vector<16x128xf32>
    %cst_108 = arith.constant dense<0.000000e+00> : vector<16x32xf32>
    %100 = tpu.matmul %99, %89, %cst_108 {dimension_numbers = #tpu.dot_dimension_numbers<[1], [0], [0], [1], [0, 0, 1, 1], [], []>} : vector<16x128xf32>, vector<128x32xf32>, vector<16x32xf32> -> vector<16x32xf32>
    %101 = arith.addf %85, %100 : vector<16x32xf32>
    %cst_109 = arith.constant dense<0.000000e+00> : vector<16x32xf32>
    %102 = tpu.matmul %99, %91, %cst_109 {dimension_numbers = #tpu.dot_dimension_numbers<[1], [0], [0], [1], [0, 0, 1, 1], [], []>} : vector<16x128xf32>, vector<128x32xf32>, vector<16x32xf32> -> vector<16x32xf32>
    %103 = arith.addf %87, %102 : vector<16x32xf32>
    %104 = arith.maximumf %95, %97 : vector<16x32xf32>
    %105 = arith.maximumf %101, %103 : vector<16x32xf32>
    %106 = arith.maximumf %104, %105 : vector<16x32xf32>
    %c0_110 = arith.constant 0 : index
    %c0_111 = arith.constant 0 : index
    %107 = vector.load %arg5[%c0_110, %c0_111] : memref<1x32xf32, #tpu.memory_space<vmem>>, vector<1x32xf32>
    %108 = vector.broadcast %107 : vector<1x32xf32> to vector<16x32xf32>
    %109 = arith.addf %106, %108 : vector<16x32xf32>
    %110 = math.tanh %109 : vector<16x32xf32>
    %111 = vector.shape_cast %110 : vector<16x32xf32> to vector<2x8x32xf32>
    %cst_112 = arith.constant 0.000000e+00 : f32
    %112 = vector.broadcast %cst_112 : f32 to vector<2x32xf32>
    %113 = vector.extract_strided_slice %111 {offsets = [0, 0, 0], sizes = [2, 1, 32], strides = [1, 1, 1]} : vector<2x8x32xf32> to vector<2x1x32xf32>
    %114 = vector.shape_cast %113 : vector<2x1x32xf32> to vector<2x32xf32>
    %c0_113 = arith.constant 0 : index
    %c0_114 = arith.constant 0 : index
    %c0_115 = arith.constant 0 : index
    %115 = vector.load %arg6[%c0_113, %c0_114, %c0_115] : memref<8x32x32xf32, #tpu.memory_space<vmem>>, vector<1x32x32xf32>
    %116 = vector.shape_cast %115 : vector<1x32x32xf32> to vector<32x32xf32>
    %cst_116 = arith.constant dense<0.000000e+00> : vector<2x32xf32>
    %117 = tpu.matmul %114, %116, %cst_116 {dimension_numbers = #tpu.dot_dimension_numbers<[1], [0], [0], [1], [0, 0, 1, 1], [], []>} : vector<2x32xf32>, vector<32x32xf32>, vector<2x32xf32> -> vector<2x32xf32>
    %118 = arith.addf %112, %117 : vector<2x32xf32>
    %119 = vector.extract_strided_slice %111 {offsets = [0, 1, 0], sizes = [2, 1, 32], strides = [1, 1, 1]} : vector<2x8x32xf32> to vector<2x1x32xf32>
    %120 = vector.shape_cast %119 : vector<2x1x32xf32> to vector<2x32xf32>
    %c1_117 = arith.constant 1 : index
    %c0_118 = arith.constant 0 : index
    %c0_119 = arith.constant 0 : index
    %121 = vector.load %arg6[%c1_117, %c0_118, %c0_119] : memref<8x32x32xf32, #tpu.memory_space<vmem>>, vector<1x32x32xf32>
    %122 = vector.shape_cast %121 : vector<1x32x32xf32> to vector<32x32xf32>
    %cst_120 = arith.constant dense<0.000000e+00> : vector<2x32xf32>
    %123 = tpu.matmul %120, %122, %cst_120 {dimension_numbers = #tpu.dot_dimension_numbers<[1], [0], [0], [1], [0, 0, 1, 1], [], []>} : vector<2x32xf32>, vector<32x32xf32>, vector<2x32xf32> -> vector<2x32xf32>
    %124 = arith.addf %118, %123 : vector<2x32xf32>
    %125 = vector.extract_strided_slice %111 {offsets = [0, 2, 0], sizes = [2, 1, 32], strides = [1, 1, 1]} : vector<2x8x32xf32> to vector<2x1x32xf32>
    %126 = vector.shape_cast %125 : vector<2x1x32xf32> to vector<2x32xf32>
    %c2_121 = arith.constant 2 : index
    %c0_122 = arith.constant 0 : index
    %c0_123 = arith.constant 0 : index
    %127 = vector.load %arg6[%c2_121, %c0_122, %c0_123] : memref<8x32x32xf32, #tpu.memory_space<vmem>>, vector<1x32x32xf32>
    %128 = vector.shape_cast %127 : vector<1x32x32xf32> to vector<32x32xf32>
    %cst_124 = arith.constant dense<0.000000e+00> : vector<2x32xf32>
    %129 = tpu.matmul %126, %128, %cst_124 {dimension_numbers = #tpu.dot_dimension_numbers<[1], [0], [0], [1], [0, 0, 1, 1], [], []>} : vector<2x32xf32>, vector<32x32xf32>, vector<2x32xf32> -> vector<2x32xf32>
    %130 = arith.addf %124, %129 : vector<2x32xf32>
    %131 = vector.extract_strided_slice %111 {offsets = [0, 3, 0], sizes = [2, 1, 32], strides = [1, 1, 1]} : vector<2x8x32xf32> to vector<2x1x32xf32>
    %132 = vector.shape_cast %131 : vector<2x1x32xf32> to vector<2x32xf32>
    %c3 = arith.constant 3 : index
    %c0_125 = arith.constant 0 : index
    %c0_126 = arith.constant 0 : index
    %133 = vector.load %arg6[%c3, %c0_125, %c0_126] : memref<8x32x32xf32, #tpu.memory_space<vmem>>, vector<1x32x32xf32>
    %134 = vector.shape_cast %133 : vector<1x32x32xf32> to vector<32x32xf32>
    %cst_127 = arith.constant dense<0.000000e+00> : vector<2x32xf32>
    %135 = tpu.matmul %132, %134, %cst_127 {dimension_numbers = #tpu.dot_dimension_numbers<[1], [0], [0], [1], [0, 0, 1, 1], [], []>} : vector<2x32xf32>, vector<32x32xf32>, vector<2x32xf32> -> vector<2x32xf32>
    %136 = arith.addf %130, %135 : vector<2x32xf32>
    %137 = vector.extract_strided_slice %111 {offsets = [0, 4, 0], sizes = [2, 1, 32], strides = [1, 1, 1]} : vector<2x8x32xf32> to vector<2x1x32xf32>
    %138 = vector.shape_cast %137 : vector<2x1x32xf32> to vector<2x32xf32>
    %c4 = arith.constant 4 : index
    %c0_128 = arith.constant 0 : index
    %c0_129 = arith.constant 0 : index
    %139 = vector.load %arg6[%c4, %c0_128, %c0_129] : memref<8x32x32xf32, #tpu.memory_space<vmem>>, vector<1x32x32xf32>
    %140 = vector.shape_cast %139 : vector<1x32x32xf32> to vector<32x32xf32>
    %cst_130 = arith.constant dense<0.000000e+00> : vector<2x32xf32>
    %141 = tpu.matmul %138, %140, %cst_130 {dimension_numbers = #tpu.dot_dimension_numbers<[1], [0], [0], [1], [0, 0, 1, 1], [], []>} : vector<2x32xf32>, vector<32x32xf32>, vector<2x32xf32> -> vector<2x32xf32>
    %142 = arith.addf %136, %141 : vector<2x32xf32>
    %143 = vector.extract_strided_slice %111 {offsets = [0, 5, 0], sizes = [2, 1, 32], strides = [1, 1, 1]} : vector<2x8x32xf32> to vector<2x1x32xf32>
    %144 = vector.shape_cast %143 : vector<2x1x32xf32> to vector<2x32xf32>
    %c5 = arith.constant 5 : index
    %c0_131 = arith.constant 0 : index
    %c0_132 = arith.constant 0 : index
    %145 = vector.load %arg6[%c5, %c0_131, %c0_132] : memref<8x32x32xf32, #tpu.memory_space<vmem>>, vector<1x32x32xf32>
    %146 = vector.shape_cast %145 : vector<1x32x32xf32> to vector<32x32xf32>
    %cst_133 = arith.constant dense<0.000000e+00> : vector<2x32xf32>
    %147 = tpu.matmul %144, %146, %cst_133 {dimension_numbers = #tpu.dot_dimension_numbers<[1], [0], [0], [1], [0, 0, 1, 1], [], []>} : vector<2x32xf32>, vector<32x32xf32>, vector<2x32xf32> -> vector<2x32xf32>
    %148 = arith.addf %142, %147 : vector<2x32xf32>
    %149 = vector.extract_strided_slice %111 {offsets = [0, 6, 0], sizes = [2, 1, 32], strides = [1, 1, 1]} : vector<2x8x32xf32> to vector<2x1x32xf32>
    %150 = vector.shape_cast %149 : vector<2x1x32xf32> to vector<2x32xf32>
    %c6 = arith.constant 6 : index
    %c0_134 = arith.constant 0 : index
    %c0_135 = arith.constant 0 : index
    %151 = vector.load %arg6[%c6, %c0_134, %c0_135] : memref<8x32x32xf32, #tpu.memory_space<vmem>>, vector<1x32x32xf32>
    %152 = vector.shape_cast %151 : vector<1x32x32xf32> to vector<32x32xf32>
    %cst_136 = arith.constant dense<0.000000e+00> : vector<2x32xf32>
    %153 = tpu.matmul %150, %152, %cst_136 {dimension_numbers = #tpu.dot_dimension_numbers<[1], [0], [0], [1], [0, 0, 1, 1], [], []>} : vector<2x32xf32>, vector<32x32xf32>, vector<2x32xf32> -> vector<2x32xf32>
    %154 = arith.addf %148, %153 : vector<2x32xf32>
    %155 = vector.extract_strided_slice %111 {offsets = [0, 7, 0], sizes = [2, 1, 32], strides = [1, 1, 1]} : vector<2x8x32xf32> to vector<2x1x32xf32>
    %156 = vector.shape_cast %155 : vector<2x1x32xf32> to vector<2x32xf32>
    %c7_137 = arith.constant 7 : index
    %c0_138 = arith.constant 0 : index
    %c0_139 = arith.constant 0 : index
    %157 = vector.load %arg6[%c7_137, %c0_138, %c0_139] : memref<8x32x32xf32, #tpu.memory_space<vmem>>, vector<1x32x32xf32>
    %158 = vector.shape_cast %157 : vector<1x32x32xf32> to vector<32x32xf32>
    %cst_140 = arith.constant dense<0.000000e+00> : vector<2x32xf32>
    %159 = tpu.matmul %156, %158, %cst_140 {dimension_numbers = #tpu.dot_dimension_numbers<[1], [0], [0], [1], [0, 0, 1, 1], [], []>} : vector<2x32xf32>, vector<32x32xf32>, vector<2x32xf32> -> vector<2x32xf32>
    %160 = arith.addf %154, %159 : vector<2x32xf32>
    %c0_141 = arith.constant 0 : index
    %c0_142 = arith.constant 0 : index
    %161 = vector.load %arg7[%c0_141, %c0_142] : memref<1x32xf32, #tpu.memory_space<vmem>>, vector<1x32xf32>
    %162 = vector.broadcast %161 : vector<1x32xf32> to vector<2x32xf32>
    %163 = arith.addf %160, %162 : vector<2x32xf32>
    %164 = math.tanh %163 : vector<2x32xf32>
    %c0_143 = arith.constant 0 : index
    %c0_144 = arith.constant 0 : index
    %165 = vector.load %arg8[%c0_143, %c0_144] : memref<32x2xf32, #tpu.memory_space<vmem>>, vector<32x2xf32>
    %cst_145 = arith.constant dense<0.000000e+00> : vector<2x2xf32>
    %166 = tpu.matmul %164, %165, %cst_145 {dimension_numbers = #tpu.dot_dimension_numbers<[1], [0], [0], [1], [0, 0, 1, 1], [], []>} : vector<2x32xf32>, vector<32x2xf32>, vector<2x2xf32> -> vector<2x2xf32>
    %c0_146 = arith.constant 0 : index
    %c0_147 = arith.constant 0 : index
    %167 = vector.load %arg9[%c0_146, %c0_147] : memref<1x2xf32, #tpu.memory_space<vmem>>, vector<1x2xf32>
    %168 = vector.broadcast %167 : vector<1x2xf32> to vector<2x2xf32>
    %169 = arith.addf %166, %168 : vector<2x2xf32>
    %c0_148 = arith.constant 0 : index
    %c0_149 = arith.constant 0 : index
    %170 = vector.load %arg10[%c0_148, %c0_149] : memref<2x2xf32, #tpu.memory_space<vmem>>, vector<2x2xf32>
    tpu.vector_store %arg10[%c0_148, %c0_149], %169 {strides = array<i32>} : memref<2x2xf32, #tpu.memory_space<vmem>>, vector<2x2xf32>,
    return
  }
  func.func @transform_0(%arg0: i32) -> (i32, i32, i32) {
    %c0_i32 = arith.constant 0 : i32
    %c0_i32_0 = arith.constant 0 : i32
    %c0_i32_1 = arith.constant 0 : i32
    %c0_i32_2 = arith.constant 0 : i32
    return %c0_i32, %c0_i32_0, %c0_i32_1 : i32, i32, i32
  }
  func.func @transform_1(%arg0: i32) -> (i32, i32, i32) {
    %c0_i32 = arith.constant 0 : i32
    %c0_i32_0 = arith.constant 0 : i32
    %c0_i32_1 = arith.constant 0 : i32
    %c0_i32_2 = arith.constant 0 : i32
    return %c0_i32, %c0_i32_0, %c0_i32_1 : i32, i32, i32
  }
  func.func @transform_2(%arg0: i32) -> (i32, i32) {
    %c0_i32 = arith.constant 0 : i32
    %c0_i32_0 = arith.constant 0 : i32
    %c0_i32_1 = arith.constant 0 : i32
    return %c0_i32, %c0_i32_0 : i32, i32
  }
  func.func @transform_3(%arg0: i32) -> (i32, i32, i32, i32) {
    %c0_i32 = arith.constant 0 : i32
    %c0_i32_0 = arith.constant 0 : i32
    %c0_i32_1 = arith.constant 0 : i32
    %c0_i32_2 = arith.constant 0 : i32
    %c0_i32_3 = arith.constant 0 : i32
    return %c0_i32, %c0_i32_0, %c0_i32_1, %c0_i32_2 : i32, i32, i32, i32
  }
  func.func @transform_4(%arg0: i32) -> (i32, i32) {
    %c0_i32 = arith.constant 0 : i32
    %c0_i32_0 = arith.constant 0 : i32
    %c0_i32_1 = arith.constant 0 : i32
    return %c0_i32, %c0_i32_0 : i32, i32
  }
  func.func @transform_5(%arg0: i32) -> (i32, i32, i32) {
    %c0_i32 = arith.constant 0 : i32
    %c0_i32_0 = arith.constant 0 : i32
    %c0_i32_1 = arith.constant 0 : i32
    %c0_i32_2 = arith.constant 0 : i32
    return %c0_i32, %c0_i32_0, %c0_i32_1 : i32, i32, i32
  }
  func.func @transform_6(%arg0: i32) -> (i32, i32) {
    %c0_i32 = arith.constant 0 : i32
    %c0_i32_0 = arith.constant 0 : i32
    %c0_i32_1 = arith.constant 0 : i32
    return %c0_i32, %c0_i32_0 : i32, i32
  }
  func.func @transform_7(%arg0: i32) -> (i32, i32) {
    %c0_i32 = arith.constant 0 : i32
    %c0_i32_0 = arith.constant 0 : i32
    %c0_i32_1 = arith.constant 0 : i32
    return %c0_i32, %c0_i32_0 : i32, i32
  }
  func.func @transform_8(%arg0: i32) -> (i32, i32) {
    %c0_i32 = arith.constant 0 : i32
    %c0_i32_0 = arith.constant 0 : i32
    %c0_i32_1 = arith.constant 0 : i32
    return %c0_i32, %c0_i32_0 : i32, i32
  }
  func.func @transform_9(%arg0: i32) -> (i32, i32) {
    %c0_i32 = arith.constant 0 : i32
    %c0_i32_0 = arith.constant 0 : i32
    %c0_i32_1 = arith.constant 0 : i32
    return %c0_i32, %c0_i32_0 : i32, i32
  }
}

</mosaic_0001>

<bundles_post_ra>
// kernel: net_dropout_forward.1
= control target key start
LH: loop header
LB: loop body
LE: loop exit
PB: predicated region body
PF: predicated region fallthrough
CT: control target
= control target key end

     0   :  { %vm33_vm0 = vcmask 785408   ;;  %v4237_v7 = vmov 0.0   ;;  %s5370_s0 = inlined_call_operand.vmem [shape: f32[2,32,96], index: 0, kind: input, shape index: {}]   ;;  %s5371_s1 = inlined_call_operand.vmem [shape: f32[3,96,256], index: 1, kind: input, shape index: {}]   ;;  %s5372_s2 = inlined_call_operand.vmem [shape: f32[1,128], index: 2, kind: input, shape index: {}]   ;;  %s5373_s3 = inlined_call_operand.vmem [shape: f32[2,3,128,32], index: 3, kind: input, shape index: {}]   ;;  %s5374_s4 = inlined_call_operand.vmem [shape: f32[1,32], index: 4, kind: input, shape index: {}]   ;;  %s5375_s5 = inlined_call_operand.vmem [shape: f32[8,32,32], index: 5, kind: input, shape index: {}]   ;;  %s5376_s6 = inlined_call_operand.vmem [shape: f32[1,32], index: 6, kind: input, shape index: {}]   ;;  %s5377_s7 = inlined_call_operand.vmem [shape: f32[32,2], index: 7, kind: input, shape index: {}]   ;;  %s5378_s8 = inlined_call_operand.vmem [shape: f32[1,2], index: 8, kind: input, shape index: {}]   ;;  %s5379_s9 = inlined_call_operand.hbm [shape: f32[2,2], index: 9, kind: output, shape index: {}]  }
   0x1   :  { %v2592_v0 = vld [vmem:[%s5371_s1 + $0xc8] sm:$0xff]  ;;  %v2594_v1 = vld [vmem:[%s5371_s1 + $0xd8] sm:$0xff]  ;;  %v2591_v2 = vld [vmem:[%s5371_s1 + $0xc0] sm:$0xff]  ;;  %203 = vmatprep.mubr.f32.mxu0 %v4237_v7  ;;  %785 = vst [vmem:[#allocation3] sm:$0xff] %v4237_v7  ;;  %405 = vmatprep.mubr.f32.mxu1 %v4237_v7 }
   0x2   :  { %v3564_v3 = vpack.c.bf16 %v2594_v1, %v2592_v0  ;;  %v2593_v4 = vld [vmem:[%s5371_s1 + $0xd0] sm:$0xff]  ;;  %v2596_v5 = vld [vmem:[%s5371_s1 + $0xe8] sm:$0xff]  ;;  %v2598_v6 = vld [vmem:[%s5371_s1 + $0xf8] sm:$0xff]  ;;  %786 = vst [vmem:[#allocation3 + $0x20] sm:$0xff] %v4237_v7 }
   0x3   :  { %787 = vst [vmem:[#allocation3 + $0x18] sm:$0xff] %v4237_v7  ;;  %788 = vst [vmem:[#allocation3 + $0x38] sm:$0xff] %v4237_v7  ;;  %v3566_v8 = vpack.c.bf16 %v2593_v4, %v2591_v2  ;;  %v3568_v9 = vpack.c.bf16 %v2598_v6, %v2596_v5  ;;  %v2595_v10 = vld [vmem:[%s5371_s1 + $0xe0] sm:$0xff]  ;;  %v2597_v11 = vld [vmem:[%s5371_s1 + $0xf0] sm:$0xff] }
   0x4   :  { %34 = vst.msk [vmem:[#allocation2] sm:$0xff] %vm33_vm0, %v4237_v7  ;;  %35 = vst.msk [vmem:[#allocation2 + $0x30] sm:$0xff] %vm33_vm0, %v4237_v7  ;;  %v2600_v12 = vld [vmem:[%s5371_s1 + $0x108] sm:$0xff]  ;;  %3565 = vmatprep.subr.bf16.mxu0 %v3564_v3  ;;  %3613 = vmatprep.subr.bf16.mxu1 %v3564_v3  ;;  %v2602_v13 = vld [vmem:[%s5371_s1 + $0x118] sm:$0xff]  ;;  %v3570_v14 = vpack.c.bf16 %v2597_v11, %v2595_v10 }
   0x5   :  { %36 = vst.msk [vmem:[#allocation2 + $0x28] sm:$0xff] %vm33_vm0, %v4237_v7  ;;  %37 = vst.msk [vmem:[#allocation2 + $0x58] sm:$0xff] %vm33_vm0, %v4237_v7  ;;  %3567 = vmatpush1.bf16.msra.mxu0 %v3566_v8  ;;  %3615 = vmatpush1.bf16.msra.mxu1 %v3566_v8  ;;  %v3572_v15 = vpack.c.bf16 %v2602_v13, %v2600_v12  ;;  %v2599_v16 = vld [vmem:[%s5371_s1 + $0x100] sm:$0xff]  ;;  %v2601_v17 = vld [vmem:[%s5371_s1 + $0x110] sm:$0xff] }
   0x6   :  { %3569 = vmatprep.subr.bf16.mxu0 %v3568_v9  ;;  %3617 = vmatprep.subr.bf16.mxu1 %v3568_v9  ;;  %v2604_v18 = vld [vmem:[%s5371_s1 + $0x128] sm:$0xff]  ;;  %v2606_v19 = vld [vmem:[%s5371_s1 + $0x138] sm:$0xff]  ;;  %v3574_v20 = vpack.c.bf16 %v2601_v17, %v2599_v16  ;;  %v38_v21 = vld [vmem:[%s5370_s0] sm:$0xff] }
   0x7   :  { %v3576_v22 = vpack.c.bf16 %v2606_v19, %v2604_v18  ;;  %v2603_v23 = vld [vmem:[%s5371_s1 + $0x120] sm:$0xff]  ;;  %v2605_v24 = vld [vmem:[%s5371_s1 + $0x130] sm:$0xff]  ;;  %v39_v25 = vld [vmem:[%s5370_s0 + $0x8] sm:$0xff]  ;;  %46 = vst.msk [vmem:[#allocation2 + $0x8] sm:$0xff] %vm33_vm0, %v38_v21 }
   0x8   :  { %v2608_v26 = vld [vmem:[%s5371_s1 + $0x148] sm:$0xff]  ;;  %v2610_v27 = vld [vmem:[%s5371_s1 + $0x158] sm:$0xff]  ;;  %47 = vst.msk [vmem:[#allocation2 + $0x10] sm:$0xff] %vm33_vm0, %v39_v25  ;;  %v3578_v28 = vpack.c.bf16 %v2605_v24, %v2603_v23  ;;  %v2607_v29 = vld [vmem:[%s5371_s1 + $0x140] sm:$0xff] }
   0x9   :  { %3571 = vmatpush1.bf16.msra.mxu0 %v3570_v14  ;;  %3619 = vmatpush1.bf16.msra.mxu1 %v3570_v14  ;;  %v3580_v30 = vpack.c.bf16 %v2610_v27, %v2608_v26  ;;  %v2609_v31 = vld [vmem:[%s5371_s1 + $0x150] sm:$0xff]  ;;  %v41_v33 = vld [vmem:[%s5370_s0 + $0x18] sm:$0xff]  ;;  %v2612_v34 = vld [vmem:[%s5371_s1 + $0x168] sm:$0xff] }
   0xa   :  { %3573 = vmatprep.subr.bf16.mxu0 %v3572_v15  ;;  %3621 = vmatprep.subr.bf16.mxu1 %v3572_v15  ;;  %v40_v32 = vld [vmem:[%s5370_s0 + $0x10] sm:$0xff]  ;;  %v2614_v35 = vld [vmem:[%s5371_s1 + $0x178] sm:$0xff]  ;;  %49 = vst.msk [vmem:[#allocation2 + $0x20] sm:$0xff] %vm33_vm0, %v41_v33  ;;  %v42_v36 = vld [vmem:[%s5370_s0 + $0x20] sm:$0xff]  ;;  %v3582_v38 = vpack.c.bf16 %v2609_v31, %v2607_v29 }
   0xb   :  { %48 = vst.msk [vmem:[#allocation2 + $0x18] sm:$0xff] %vm33_vm0, %v40_v32  ;;  %v43_v37 = vld [vmem:[%s5370_s0 + $0x28] sm:$0xff]  ;;  %50 = vst.msk [vmem:[#allocation2 + $0x38] sm:$0xff] %vm33_vm0, %v42_v36  ;;  %v3584_v39 = vpack.c.bf16 %v2614_v35, %v2612_v34  ;;  %v2611_v40 = vld [vmem:[%s5371_s1 + $0x160] sm:$0xff] }
   0xc   :  { %51 = vst.msk [vmem:[#allocation2 + $0x40] sm:$0xff] %vm33_vm0, %v43_v37  ;;  %v2613_v41 = vld [vmem:[%s5371_s1 + $0x170] sm:$0xff]  ;;  %v55_v42 = vld [vmem:[%s5371_s1 + $0x8] sm:$0xff]  ;;  %v57_v43 = vld [vmem:[%s5371_s1 + $0x18] sm:$0xff] }
   0xd   :  { %3575 = vmatpush1.bf16.msra.mxu0 %v3574_v20  ;;  %3623 = vmatpush1.bf16.msra.mxu1 %v3574_v20  ;;  %v44_v44 = vld [vmem:[%s5370_s0 + $0x30] sm:$0xff]  ;;  %v45_v45 = vld [vmem:[%s5370_s0 + $0x38] sm:$0xff]  ;;  %v3586_v46 = vpack.c.bf16 %v2613_v41, %v2611_v40  ;;  %v3588_v47 = vpack.c.bf16 %v57_v43, %v55_v42  ;;  %v54_v48 = vld [vmem:[%s5371_s1] sm:$0xff] }
   0xe   :  { %3577 = vmatprep.subr.bf16.mxu0 %v3576_v22  ;;  %3625 = vmatprep.subr.bf16.mxu1 %v3576_v22  ;;  %52 = vst.msk [vmem:[#allocation2 + $0x48] sm:$0xff] %vm33_vm0, %v44_v44  ;;  %53 = vst.msk [vmem:[#allocation2 + $0x50] sm:$0xff] %vm33_vm0, %v45_v45  ;;  %v56_v49 = vld [vmem:[%s5371_s1 + $0x10] sm:$0xff]  ;;  %v59_v50 = vld [vmem:[%s5371_s1 + $0x28] sm:$0xff] }
   0xf   :  { %v61_v51 = vld [vmem:[%s5371_s1 + $0x38] sm:$0xff]  ;;  %v4427_v52 = vld [vmem:[#allocation2 + $0x8] ss:$2 sm:$0xff]  ;;  %v3590_v53 = vpack.c.bf16 %v56_v49, %v54_v48  ;;  %v4429_v54 = vld [vmem:[#allocation2 + $0x9] ss:$2 sm:$0xff] }
  0x10   :  { %v3592_v55 = vpack.c.bf16 %v61_v51, %v59_v50  ;;  %v58_v56 = vld [vmem:[%s5371_s1 + $0x20] sm:$0xff]  ;;  %v60_v57 = vld [vmem:[%s5371_s1 + $0x30] sm:$0xff]  ;;  %v63_v58 = vld [vmem:[%s5371_s1 + $0x48] sm:$0xff] }
  0x11   :  { %3579 = vmatpush1.bf16.msra.mxu0 %v3578_v28  ;;  %3627 = vmatpush1.bf16.msra.mxu1 %v3578_v28  ;;  %v65_v59 = vld [vmem:[%s5371_s1 + $0x58] sm:$0xff]  ;;  %v3594_v60 = vpack.c.bf16 %v60_v57, %v58_v56  ;;  %v62_v0 = vld [vmem:[%s5371_s1 + $0x40] sm:$0xff]  ;;  %v64_v1 = vld [vmem:[%s5371_s1 + $0x50] sm:$0xff] }
  0x12   :  { %3581 = vmatprep.subr.bf16.mxu0 %v3580_v30  ;;  %3629 = vmatprep.subr.bf16.mxu1 %v3580_v30  ;;  %v4447_v61 = vld [vmem:[#allocation2 + $0x18] ss:$2 sm:$0xff]  ;;  %v4449_v62 = vld [vmem:[#allocation2 + $0x19] ss:$2 sm:$0xff]  ;;  %v3596_v63 = vpack.c.bf16 %v65_v59, %v63_v58  ;;  %v67_v2 = vld [vmem:[%s5371_s1 + $0x68] sm:$0xff]  ;;  %v3598_v4 = vpack.c.bf16 %v64_v1, %v62_v0 }
  0x13   :  { %v69_v3 = vld [vmem:[%s5371_s1 + $0x78] sm:$0xff] }
  0x14   :  { %v4469_v5 = vld [vmem:[#allocation2 + $0x38] ss:$2 sm:$0xff]  ;;  %v4471_v6 = vld [vmem:[#allocation2 + $0x39] ss:$2 sm:$0xff] }
  0x15   :  { %3583 = vmatpush1.bf16.msra.mxu0 %v3582_v38  ;;  %3631 = vmatpush1.bf16.msra.mxu1 %v3582_v38 }
  0x16   :  { %3585 = vmatprep.subr.bf16.mxu0 %v3584_v39  ;;  %3633 = vmatprep.subr.bf16.mxu1 %v3584_v39 }
  0x19   :  { %3587 = vmatpush1.bf16.msra.mxu0 %v3586_v46  ;;  %3635 = vmatpush1.bf16.msra.mxu1 %v3586_v46 }
  0x1a   :  { %3589 = vmatprep.subr.bf16.mxu0 %v3588_v47  ;;  %3637 = vmatprep.subr.bf16.mxu1 %v3588_v47 }
  0x1c   :  { %2615 = vmatmul.mubr.msk.f32.vlgmr.msra.gmra.mrb[0].mxu0 %vm33_vm0, %v4427_v52  ;;  %2623 = vmatmul.mubr.msk.f32.vlgmr.msra.gmra.mrb[0].mxu1 %vm33_vm0, %v4429_v54 }
  0x1d   :  { %3591 = vmatpush1.bf16.msra.mxu0 %v3590_v53  ;;  %3639 = vmatpush1.bf16.msra.mxu1 %v3590_v53 }
  0x1e   :  { %3593 = vmatprep.subr.bf16.mxu0 %v3592_v55  ;;  %3641 = vmatprep.subr.bf16.mxu1 %v3592_v55 }
  0x1f   :  { %209 = vmatprep.mubr.f32.mxu0 %v4237_v7  ;;  %411 = vmatprep.mubr.f32.mxu1 %v4237_v7 }
  0x20   :  { %2616 = vmatmul.mubr.msk.f32.gmra.mrb[2].mxu0 %vm33_vm0, %v4447_v61  ;;  %2624 = vmatmul.mubr.msk.f32.gmra.mrb[2].mxu1 %vm33_vm0, %v4449_v62 }
  0x21   :  { %3595 = vmatpush1.bf16.msra.mxu0 %v3594_v60  ;;  %3643 = vmatpush1.bf16.msra.mxu1 %v3594_v60 }
  0x22   :  { %14 = vsyncpa [#allocation5], 0  ;;  %3597 = vmatprep.subr.bf16.mxu0 %v3596_v63  ;;  %3645 = vmatprep.subr.bf16.mxu1 %v3596_v63  ;;  %v3600_v8 = vpack.c.bf16 %v69_v3, %v67_v2  ;;  %v66_v9 = vld [vmem:[%s5371_s1 + $0x60] sm:$0xff]  ;;  %v68_v10 = vld [vmem:[%s5371_s1 + $0x70] sm:$0xff]  ;;  %vm4239_vm1 = vmmov 0   ;;  %vm1847_vm2 = vcmask 1041409  }
  0x23   :  { %215 = vmatprep.mubr.f32.mxu0 %v4237_v7  ;;  %v71_v11 = vld [vmem:[%s5371_s1 + $0x88] sm:$0xff]  ;;  %v73_v12 = vld [vmem:[%s5371_s1 + $0x98] sm:$0xff]  ;;  %417 = vmatprep.mubr.f32.mxu1 %v4237_v7  ;;  %v3602_v13 = vpack.c.bf16 %v68_v10, %v66_v9  ;;  %v70_v17 = vld [vmem:[%s5371_s1 + $0x80] sm:$0xff]  ;;  %vm1849_vm3 = vcmask 261120   ;;  %vm2575_vm4 = vcmask 9216  }
  0x24   :  { %2617 = vmatmul.mubr.msk.f32.gmra.mrb[4].mxu0 %vm33_vm0, %v4469_v5  ;;  %2625 = vmatmul.mubr.msk.f32.gmra.mrb[4].mxu1 %vm33_vm0, %v4471_v6  ;;  %v4491_v14 = vld [vmem:[#allocation2 + $0x48] ss:$2 sm:$0xff]  ;;  %v4493_v15 = vld [vmem:[#allocation2 + $0x49] ss:$2 sm:$0xff]  ;;  %v3604_v16 = vpack.c.bf16 %v73_v12, %v71_v11  ;;  %v77_v20 = vld [vmem:[%s5371_s1 + $0xb8] sm:$0xff] }
  0x25   :  { %3599 = vmatpush1.bf16.msra.mxu0 %v3598_v4  ;;  %3647 = vmatpush1.bf16.msra.mxu1 %v3598_v4  ;;  %v72_v18 = vld [vmem:[%s5371_s1 + $0x90] sm:$0xff]  ;;  %v75_v19 = vld [vmem:[%s5371_s1 + $0xa8] sm:$0xff]  ;;  %v74_v23 = vld [vmem:[%s5371_s1 + $0xa0] sm:$0xff] }
  0x26   :  { %3601 = vmatprep.subr.bf16.mxu0 %v3600_v8  ;;  %3649 = vmatprep.subr.bf16.mxu1 %v3600_v8  ;;  %v3606_v21 = vpack.c.bf16 %v72_v18, %v70_v17  ;;  %v3608_v22 = vpack.c.bf16 %v77_v20, %v75_v19  ;;  %v76_v24 = vld [vmem:[%s5371_s1 + $0xb0] sm:$0xff]  ;;  %v2632_v25 = vld [vmem:[%s5371_s1 + $0x188] sm:$0xff]  ;;  %v2634_v26 = vld [vmem:[%s5371_s1 + $0x198] sm:$0xff] }
  0x27   :  { %221 = vmatprep.mubr.f32.mxu0 %v4237_v7  ;;  %423 = vmatprep.mubr.f32.mxu1 %v4237_v7  ;;  %v3610_v27 = vpack.c.bf16 %v76_v24, %v74_v23  ;;  %v3660_v28 = vpack.c.bf16 %v2634_v26, %v2632_v25  ;;  %v2631_v29 = vld [vmem:[%s5371_s1 + $0x180] sm:$0xff]  ;;  %v2633_v30 = vld [vmem:[%s5371_s1 + $0x190] sm:$0xff]  ;;  %v2636_v31 = vld [vmem:[%s5371_s1 + $0x1a8] sm:$0xff] }
  0x28   :  { %2618 = vmatmul.mubr.msk.f32.gmra.mrb[6].mxu0 %vm33_vm0, %v4491_v14  ;;  %2626 = vmatmul.mubr.msk.f32.gmra.mrb[6].mxu1 %vm33_vm0, %v4493_v15  ;;  %v2638_v32 = vld [vmem:[%s5371_s1 + $0x1b8] sm:$0xff]  ;;  %v79_v33 = vld [vmem:[#allocation2 + $0x7] ss:$2 sm:$0xff]  ;;  %v3662_v34 = vpack.c.bf16 %v2633_v30, %v2631_v29 }
  0x29   :  { %3603 = vmatpush1.bf16.msra.mxu0 %v3602_v13  ;;  %3651 = vmatpush1.bf16.msra.mxu1 %v3602_v13  ;;  %v3664_v35 = vpack.c.bf16 %v2638_v32, %v2636_v31  ;;  %v2635_v36 = vld [vmem:[%s5371_s1 + $0x1a0] sm:$0xff]  ;;  %v2637_v37 = vld [vmem:[%s5371_s1 + $0x1b0] sm:$0xff]  ;;  %v2640_v38 = vld [vmem:[%s5371_s1 + $0x1c8] sm:$0xff] }
  0x2a   :  { %3605 = vmatprep.subr.bf16.mxu0 %v3604_v16  ;;  %3653 = vmatprep.subr.bf16.mxu1 %v3604_v16  ;;  %v2642_v39 = vld [vmem:[%s5371_s1 + $0x1d8] sm:$0xff]  ;;  %v3666_v40 = vpack.c.bf16 %v2637_v37, %v2635_v36  ;;  %v2639_v43 = vld [vmem:[%s5371_s1 + $0x1c0] sm:$0xff]  ;;  %v2641_v44 = vld [vmem:[%s5371_s1 + $0x1d0] sm:$0xff] }
  0x2b   :  { %304 = vmatprep.mubr.f32.mxu0 %v4237_v7  ;;  %494 = vmatprep.mubr.f32.mxu1 %v4237_v7  ;;  %v81_v41 = vld [vmem:[#allocation2 + $0x17] ss:$2 sm:$0xff]  ;;  %v3668_v42 = vpack.c.bf16 %v2642_v39, %v2640_v38  ;;  %v2644_v45 = vld [vmem:[%s5371_s1 + $0x1e8] sm:$0xff]  ;;  %v3670_v47 = vpack.c.bf16 %v2641_v44, %v2639_v43 }
  0x2c   :  { %v2646_v46 = vld [vmem:[%s5371_s1 + $0x1f8] sm:$0xff]  ;;  %v2643_v50 = vld [vmem:[%s5371_s1 + $0x1e0] sm:$0xff]  ;;  %v2645_v51 = vld [vmem:[%s5371_s1 + $0x1f0] sm:$0xff] }
  0x2d   :  { %3607 = vmatpush1.bf16.msra.mxu0 %v3606_v21  ;;  %3655 = vmatpush1.bf16.msra.mxu1 %v3606_v21  ;;  %v83_v48 = vld [vmem:[#allocation2 + $0x37] ss:$2 sm:$0xff]  ;;  %v3672_v49 = vpack.c.bf16 %v2646_v46, %v2644_v45  ;;  %v3674_v55 = vpack.c.bf16 %v2645_v51, %v2643_v50  ;;  %v85_v56 = vld [vmem:[#allocation2 + $0x47] ss:$2 sm:$0xff]  ;;  %v545_v4 = vld [vmem:[#allocation2 + $0xa] ss:$2 sm:$0xff] }
  0x2e   :  { %3609 = vmatprep.subr.bf16.mxu0 %v3608_v22  ;;  %3657 = vmatprep.subr.bf16.mxu1 %v3608_v22  ;;  %v2650_v53 = vld [vmem:[%s5371_s1 + $0x218] sm:$0xff]  ;;  %v2647_v58 = vld [vmem:[%s5371_s1 + $0x200] sm:$0xff]  ;;  %v2649_v59 = vld [vmem:[%s5371_s1 + $0x210] sm:$0xff] }
  0x2f   :  { %v2652_v60 = vld [vmem:[%s5371_s1 + $0x228] sm:$0xff]  ;;  %v3678_v63 = vpack.c.bf16 %v2649_v59, %v2647_v58  ;;  %v2651_v1 = vld [vmem:[%s5371_s1 + $0x220] sm:$0xff]  ;;  %v2653_v2 = vld [vmem:[%s5371_s1 + $0x230] sm:$0xff] }
  0x30   :  { %v3682_v3 = vpack.c.bf16 %v2653_v2, %v2651_v1  ;;  %v549_v8 = vld [vmem:[#allocation2 + $0x3a] ss:$2 sm:$0xff]  ;;  %v2682_v12 = vld [vmem:[%s5373_s3 + $0x90] sm:$0xff] }
  0x31   :  { %3611 = vmatpush1.bf16.msra.mxu0 %v3610_v27  ;;  %3659 = vmatpush1.bf16.msra.mxu1 %v3610_v27  ;;  %v2696_v9 = vld [vmem:[%s5373_s3 + $0x200] sm:$0xff]  ;;  %v2683_v13 = vld [vmem:[%s5373_s3 + $0x98] sm:$0xff]  ;;  %v2685_v19 = vld [vmem:[%s5373_s3 + $0xa8] sm:$0xff] }
  0x32   :  { %3661 = vmatprep.subr.bf16.mxu0 %v3660_v28  ;;  %3685 = vmatprep.subr.bf16.mxu1 %v3660_v28  ;;  %v2699_v16 = vld [vmem:[%s5373_s3 + $0x218] sm:$0xff]  ;;  %v2684_v18 = vld [vmem:[%s5373_s3 + $0xa0] sm:$0xff]  ;;  %v2701_v22 = vld [vmem:[%s5373_s3 + $0x228] sm:$0xff] }
  0x33   :  { %v2700_v20 = vld [vmem:[%s5373_s3 + $0x220] sm:$0xff]  ;;  %v4680_v21 = vpack.c.bf16 %v2685_v19, %v2684_v18  ;;  %v2686_v24 = vld [vmem:[%s5373_s3 + $0xb0] sm:$0xff]  ;;  %v2687_v25 = vld [vmem:[%s5373_s3 + $0xb8] sm:$0xff] }
  0x34   :  { %2619 = vmatmul.mubr.msk.f32.vlgmr.msra.gmra.mrb[0].mxu0 %vm33_vm0, %v79_v33  ;;  %2627 = vmatmul.mubr.msk.f32.vlgmr.msra.gmra.mrb[0].mxu1 %vm33_vm0, %v4427_v52  ;;  %v2648_v52 = vld [vmem:[%s5371_s1 + $0x208] sm:$0xff]  ;;  %v4685_v23 = vpack.c.bf16 %v2701_v22, %v2700_v20  ;;  %v2702_v26 = vld [vmem:[%s5373_s3 + $0x230] sm:$0xff]  ;;  %v4700_v27 = vpack.c.bf16 %v2687_v25, %v2686_v24  ;;  %v2703_v28 = vld [vmem:[%s5373_s3 + $0x238] sm:$0xff] }
  0x35   :  { %3663 = vmatpush1.bf16.msra.mxu0 %v3662_v34  ;;  %3687 = vmatpush1.bf16.msra.mxu1 %v3662_v34  ;;  %v3676_v57 = vpack.c.bf16 %v2650_v53, %v2648_v52  ;;  %v4705_v29 = vpack.c.bf16 %v2703_v28, %v2702_v26  ;;  %v2688_v30 = vld [vmem:[%s5373_s3 + $0xc0] sm:$0xff]  ;;  %v2689_v31 = vld [vmem:[%s5373_s3 + $0xc8] sm:$0xff]  ;;  %v2690_v36 = vld [vmem:[%s5373_s3 + $0xd0] sm:$0xff] }
  0x36   :  { %3665 = vmatprep.subr.bf16.mxu0 %v3664_v35  ;;  %3689 = vmatprep.subr.bf16.mxu1 %v3664_v35  ;;  %v2704_v32 = vld [vmem:[%s5373_s3 + $0x240] sm:$0xff]  ;;  %v4720_v33 = vpack.c.bf16 %v2689_v31, %v2688_v30  ;;  %v2705_v34 = vld [vmem:[%s5373_s3 + $0x248] sm:$0xff]  ;;  %v2691_v37 = vld [vmem:[%s5373_s3 + $0xd8] sm:$0xff] }
  0x37   :  { %310 = vmatprep.mubr.f32.mxu0 %v4237_v7  ;;  %500 = vmatprep.mubr.f32.mxu1 %v4237_v7  ;;  %v4725_v35 = vpack.c.bf16 %v2705_v34, %v2704_v32  ;;  %v2706_v38 = vld [vmem:[%s5373_s3 + $0x250] sm:$0xff]  ;;  %v4740_v39 = vpack.c.bf16 %v2691_v37, %v2690_v36  ;;  %v2693_v43 = vld [vmem:[%s5373_s3 + $0xe8] sm:$0xff]  ;;  %v2708_v44 = vld [vmem:[%s5373_s3 + $0x260] sm:$0xff] }
  0x38   :  { %2620 = vmatmul.mubr.msk.f32.gmra.mrb[2].mxu0 %vm33_vm0, %v81_v41  ;;  %2628 = vmatmul.mubr.msk.f32.gmra.mrb[2].mxu1 %vm33_vm0, %v4447_v61  ;;  %v2654_v61 = vld [vmem:[%s5371_s1 + $0x238] sm:$0xff]  ;;  %v2709_v46 = vld [vmem:[%s5373_s3 + $0x268] sm:$0xff]  ;;  %v2710_v50 = vld [vmem:[%s5373_s3 + $0x270] sm:$0xff] }
  0x39   :  { %3667 = vmatpush1.bf16.msra.mxu0 %v3666_v40  ;;  %3691 = vmatpush1.bf16.msra.mxu1 %v3666_v40  ;;  %v3680_v0 = vpack.c.bf16 %v2654_v61, %v2652_v60  ;;  %v2707_v40 = vld [vmem:[%s5373_s3 + $0x258] sm:$0xff]  ;;  %v793_v53 = vld [vmem:[%s5373_s3] sm:$0xff]  ;;  %v2665_v59 = vld [vmem:[%s5373_s3 + $0x188] sm:$0xff] }
  0x3a   :  { %3669 = vmatprep.subr.bf16.mxu0 %v3668_v42  ;;  %3693 = vmatprep.subr.bf16.mxu1 %v3668_v42  ;;  %v4745_v41 = vpack.c.bf16 %v2707_v40, %v2706_v38  ;;  %v2692_v42 = vld [vmem:[%s5373_s3 + $0xe0] sm:$0xff]  ;;  %v2711_v52 = vld [vmem:[%s5373_s3 + $0x278] sm:$0xff] }
  0x3b   :  { %316 = vmatprep.mubr.f32.mxu0 %v4237_v7  ;;  %506 = vmatprep.mubr.f32.mxu1 %v4237_v7  ;;  %v4760_v45 = vpack.c.bf16 %v2693_v43, %v2692_v42  ;;  %v2664_v58 = vld [vmem:[%s5373_s3 + $0x180] sm:$0xff] }
  0x3c   :  { %2621 = vmatmul.mubr.msk.f32.gmra.mrb[4].mxu0 %vm33_vm0, %v83_v48  ;;  %2629 = vmatmul.mubr.msk.f32.gmra.mrb[4].mxu1 %vm33_vm0, %v4469_v5  ;;  %v547_v5 = vld [vmem:[#allocation2 + $0x1a] ss:$2 sm:$0xff]  ;;  %v2694_v48 = vld [vmem:[%s5373_s3 + $0xf0] sm:$0xff]  ;;  %v4802_v60 = vpack.c.bf16 %v2665_v59, %v2664_v58 }
  0x3d   :  { %3671 = vmatpush1.bf16.msra.mxu0 %v3670_v47  ;;  %3695 = vmatpush1.bf16.msra.mxu1 %v3670_v47  ;;  %v4765_v47 = vpack.c.bf16 %v2709_v46, %v2708_v44 }
  0x3e   :  { %3673 = vmatprep.subr.bf16.mxu0 %v3672_v49  ;;  %3697 = vmatprep.subr.bf16.mxu1 %v3672_v49  ;;  %v2695_v49 = vld [vmem:[%s5373_s3 + $0xf8] sm:$0xff] }
  0x3f   :  { %322 = vmatprep.mubr.f32.mxu0 %v4237_v7  ;;  %512 = vmatprep.mubr.f32.mxu1 %v4237_v7  ;;  %v4780_v51 = vpack.c.bf16 %v2695_v49, %v2694_v48  ;;  %v795_v48 = vld [vmem:[%s5373_s3 + $0x10] sm:$0xff]  ;;  %v796_v49 = vld [vmem:[%s5373_s3 + $0x18] sm:$0xff] }
  0x40   :  { %2622 = vmatmul.mubr.msk.f32.gmra.mrb[6].mxu0 %vm33_vm0, %v85_v56  ;;  %2630 = vmatmul.mubr.msk.f32.gmra.mrb[6].mxu1 %vm33_vm0, %v4491_v14  ;;  %v2698_v14 = vld [vmem:[%s5373_s3 + $0x210] sm:$0xff]  ;;  %v4791_v56 = vpack.c.bf16 %v2711_v52, %v2710_v50  ;;  %v2667_v52 = vld [vmem:[%s5373_s3 + $0x198] sm:$0xff]  ;;  %v4836_v59 = vpack.c.bf16 %v796_v49, %v795_v48 }
  0x41   :  { %3675 = vmatpush1.bf16.msra.mxu0 %v3674_v55  ;;  %3699 = vmatpush1.bf16.msra.mxu1 %v3674_v55  ;;  %v4665_v17 = vpack.c.bf16 %v2699_v16, %v2698_v14  ;;  %v794_v55 = vld [vmem:[%s5373_s3 + $0x8] sm:$0xff]  ;;  %v2666_v50 = vld [vmem:[%s5373_s3 + $0x190] sm:$0xff] }
  0x42   :  { %3677 = vmatprep.subr.bf16.mxu0 %v3676_v57  ;;  %3701 = vmatprep.subr.bf16.mxu1 %v3676_v57  ;;  %v4793_v57 = vpack.c.bf16 %v794_v55, %v793_v53  ;;  %v797_v53 = vld [vmem:[%s5373_s3 + $0x20] sm:$0xff]  ;;  %v798_v55 = vld [vmem:[%s5373_s3 + $0x28] sm:$0xff]  ;;  %v2718_v49 = vld [vmem:[%s5373_s3 + $0x130] sm:$0xff] }
  0x43   :  { %616 = vmatprep.mubr.f32.mxu0 %v4237_v7  ;;  %725 = vmatprep.mubr.f32.mxu1 %v4237_v7 }
  0x45   :  { %3679 = vmatpush1.bf16.msra.mxu0 %v3678_v63  ;;  %3703 = vmatpush1.bf16.msra.mxu1 %v3678_v63 }
  0x46   :  { %3681 = vmatprep.subr.bf16.mxu0 %v3680_v0  ;;  %3705 = vmatprep.subr.bf16.mxu1 %v3680_v0 }
  0x49   :  { %3683 = vmatpush1.bf16.msra.mxu0 %v3682_v3  ;;  %3707 = vmatpush1.bf16.msra.mxu1 %v3682_v3 }
  0x4c   :  { %2655 = vmatmul.mubr.msk.f32.vlgmr.msra.gmra.mrb[0].mxu0 %vm33_vm0, %v4429_v54  ;;  %2659 = vmatmul.mubr.msk.f32.vlgmr.msra.gmra.mrb[0].mxu1 %vm33_vm0, %v545_v4  ;;  %v551_v54 = vld [vmem:[#allocation2 + $0x4a] ss:$2 sm:$0xff]  ;;  %v2663_v4 = vld [vmem:[%s5372_s2] ss:$0 sm:$0xff] }
  0x4d   :  { %622 = vmatprep.mubr.f32.mxu0 %v4237_v7  ;;  %731 = vmatprep.mubr.f32.mxu1 %v4237_v7 }
  0x50   :  { %2656 = vmatmul.mubr.msk.f32.gmra.mrb[2].mxu0 %vm33_vm0, %v4449_v62  ;;  %2660 = vmatmul.mubr.msk.f32.gmra.mrb[2].mxu1 %vm33_vm0, %v547_v5  ;;  %v2680_v62 = vld [vmem:[%s5373_s3 + $0x80] sm:$0xff] }
  0x51   :  { %628 = vmatprep.mubr.f32.mxu0 %v4237_v7  ;;  %737 = vmatprep.mubr.f32.mxu1 %v4237_v7 }
  0x54   :  { %2657 = vmatmul.mubr.msk.f32.gmra.mrb[4].mxu0 %vm33_vm0, %v4471_v6  ;;  %2661 = vmatmul.mubr.msk.f32.gmra.mrb[4].mxu1 %vm33_vm0, %v549_v8  ;;  %v2681_v6 = vld [vmem:[%s5373_s3 + $0x88] sm:$0xff] }
  0x55   :  { %634 = vmatprep.mubr.f32.mxu0 %v4237_v7  ;;  %743 = vmatprep.mubr.f32.mxu1 %v4237_v7  ;;  %v4640_v10 = vpack.c.bf16 %v2681_v6, %v2680_v62  ;;  %v2697_v7 = vld [vmem:[%s5373_s3 + $0x208] sm:$0xff] }
  0x56   :  { %v4645_v11 = vpack.c.bf16 %v2697_v7, %v2696_v9 }
  0x57   :  { %3709 = vmatprep.subr.bf16.mxu0 %v4640_v10 }
  0x58   :  { %2658 = vmatmul.mubr.msk.f32.gmra.mrb[6].mxu0 %vm33_vm0, %v4493_v15  ;;  %2662 = vmatmul.mubr.msk.f32.gmra.mrb[6].mxu1 %vm33_vm0, %v551_v54  ;;  %v4660_v15 = vpack.c.bf16 %v2683_v13, %v2682_v12 }
  0x59   :  { %3773 = vmatprep.subr.bf16.mxu1 %v4645_v11  ;;  %3711 = vmatpush3.bf16.msra.mxu0 %v4640_v10 }
  0x5a   :  { %3775 = vmatpush3.bf16.msra.mxu1 %v4645_v11  ;;  %3713 = vmatprep.subr.bf16.mxu0 %v4660_v15 }
  0x5b   :  { %3777 = vmatprep.subr.bf16.mxu1 %v4665_v17 }
  0x5d   :  { %3715 = vmatpush3.bf16.msra.mxu0 %v4660_v15 }
  0x5e   :  { %3779 = vmatpush3.bf16.msra.mxu1 %v4665_v17  ;;  %3717 = vmatprep.subr.bf16.mxu0 %v4680_v21 }
  0x5f   :  { %3781 = vmatprep.subr.bf16.mxu1 %v4685_v23 }
  0x61   :  { %3719 = vmatpush3.bf16.msra.mxu0 %v4680_v21 }
  0x62   :  { %3783 = vmatpush3.bf16.msra.mxu1 %v4685_v23  ;;  %3721 = vmatprep.subr.bf16.mxu0 %v4700_v27 }
  0x63   :  { %3785 = vmatprep.subr.bf16.mxu1 %v4705_v29 }
  0x65   :  { %3723 = vmatpush3.bf16.msra.mxu0 %v4700_v27 }
  0x66   :  { %3787 = vmatpush3.bf16.msra.mxu1 %v4705_v29  ;;  %3725 = vmatprep.subr.bf16.mxu0 %v4720_v33 }
  0x67   :  { %3789 = vmatprep.subr.bf16.mxu1 %v4725_v35 }
  0x69   :  { %3727 = vmatpush3.bf16.msra.mxu0 %v4720_v33 }
  0x6a   :  { %3791 = vmatpush3.bf16.msra.mxu1 %v4725_v35  ;;  %3729 = vmatprep.subr.bf16.mxu0 %v4740_v39 }
  0x6b   :  { %3793 = vmatprep.subr.bf16.mxu1 %v4745_v41 }
  0x6d   :  { %3731 = vmatpush3.bf16.msra.mxu0 %v4740_v39 }
  0x6e   :  { %3795 = vmatpush3.bf16.msra.mxu1 %v4745_v41  ;;  %3733 = vmatprep.subr.bf16.mxu0 %v4760_v45 }
  0x6f   :  { %3797 = vmatprep.subr.bf16.mxu1 %v4765_v47 }
  0x71   :  { %3735 = vmatpush3.bf16.msra.mxu0 %v4760_v45 }
  0x72   :  { %3799 = vmatpush3.bf16.msra.mxu1 %v4765_v47  ;;  %3737 = vmatprep.subr.bf16.mxu0 %v4780_v51 }
  0x73   :  { %3801 = vmatprep.subr.bf16.mxu1 %v4791_v56 }
  0x75   :  { %3739 = vmatpush3.bf16.msra.mxu0 %v4780_v51 }
  0x76   :  { %3803 = vmatpush3.bf16.msra.mxu1 %v4791_v56  ;;  %3741 = vmatprep.subr.bf16.mxu0 %v4793_v57 }
  0x77   :  { %3805 = vmatprep.subr.bf16.mxu1 %v4802_v60 }
 0x11f   :  { %v618_v61 = vpop.f32.mrb[0].mxu0  ;;  %v727_v63 = vpop.f32.mrb[0].mxu1 }
 0x120   :  { %v758_v0 = vmax.f32 %v618_v61, %v727_v63  ;;  %v620_v1 = vpop.f32.mrb[1].mxu0  ;;  %v729_v2 = vpop.f32.mrb[1].mxu1  ;;  %v4838_v61 = vpack.c.bf16 %v2667_v52, %v2666_v50  ;;  %v2668_v63 = vld [vmem:[%s5373_s3 + $0x1a0] sm:$0xff]  ;;  %v2719_v50 = vld [vmem:[%s5373_s3 + $0x138] sm:$0xff]  ;;  %v2734_v52 = vld [vmem:[%s5373_s3 + $0x2b0] sm:$0xff] }
 0x121   :  { %v759_v3 = vmax.f32 %v620_v1, %v729_v2  ;;  %v4850_v2 = vpack.c.bf16 %v798_v55, %v797_v53  ;;  %v2735_v53 = vld [vmem:[%s5373_s3 + $0x2b8] sm:$0xff]  ;;  %v5109_v55 = vpack.c.bf16 %v2719_v50, %v2718_v49  ;;  %v2757_v49 = vld [vmem:[%s5375_s5 + $0x68] sm:$0xff]  ;;  %v2751_v50 = vld [vmem:[%s5375_s5 + $0x40] sm:$0xff] }
 0x123   :  { %v766_v5 = vmax.f32 %v758_v0, %v759_v3  ;;  %v624_v8 = vpop.f32.mrb[2].mxu0  ;;  %v733_v54 = vpop.f32.mrb[2].mxu1  ;;  %v2669_v0 = vld [vmem:[%s5373_s3 + $0x1a8] sm:$0xff] }
 0x124   :  { %v760_v62 = vmax.f32 %v624_v8, %v733_v54  ;;  %v626_v6 = vpop.f32.mrb[3].mxu0  ;;  %v735_v9 = vpop.f32.mrb[3].mxu1  ;;  %v4852_v3 = vpack.c.bf16 %v2669_v0, %v2668_v63  ;;  %v2670_v8 = vld [vmem:[%s5373_s3 + $0x1b0] sm:$0xff]  ;;  %v2671_v54 = vld [vmem:[%s5373_s3 + $0x1b8] sm:$0xff]  ;;  %v2736_v63 = vld [vmem:[%s5373_s3 + $0x2c0] sm:$0xff] }
 0x125   :  { %v777_v7 = vadd.f32 %v2663_v4, %v766_v5  ;;  %v761_v12 = vmax.f32 %v626_v6, %v735_v9  ;;  %v800_v5 = vld [vmem:[%s5373_s3 + $0x38] sm:$0xff]  ;;  %v4874_v6 = vpack.c.bf16 %v2671_v54, %v2670_v8  ;;  %v801_v9 = vld [vmem:[%s5373_s3 + $0x40] sm:$0xff]  ;;  %v2737_v0 = vld [vmem:[%s5373_s3 + $0x2c8] sm:$0xff] }
 0x126   :  { %v2739_v8 = vld [vmem:[%s5373_s3 + $0x2d8] sm:$0xff] }
 0x127   :  { %4198 = vtanh.f32 %v777_v7  ;;  %v767_v13 = vmax.f32 %v760_v62, %v761_v12  ;;  %v630_v14 = vpop.f32.mrb[4].mxu0  ;;  %v739_v16 = vpop.f32.mrb[4].mxu1  ;;  %v802_v7 = vld [vmem:[%s5373_s3 + $0x48] sm:$0xff]  ;;  %v2672_v12 = vld [vmem:[%s5373_s3 + $0x1c0] sm:$0xff] }
 0x128   :  { %v762_v18 = vmax.f32 %v630_v14, %v739_v16  ;;  %v632_v19 = vpop.f32.mrb[5].mxu0  ;;  %v741_v20 = vpop.f32.mrb[5].mxu1  ;;  %v4892_v14 = vpack.c.bf16 %v802_v7, %v801_v9  ;;  %v2725_v9 = vld [vmem:[%s5373_s3 + $0x168] sm:$0xff]  ;;  %v2740_v7 = vld [vmem:[%s5373_s3 + $0x2e0] sm:$0xff] }
 0x129   :  { %v778_v22 = vadd.f32 %v2663_v4, %v767_v13  ;;  %v763_v24 = vmax.f32 %v632_v19, %v741_v20  ;;  %v2673_v13 = vld [vmem:[%s5373_s3 + $0x1c8] sm:$0xff]  ;;  %v804_v19 = vld [vmem:[%s5373_s3 + $0x58] sm:$0xff]  ;;  %v2674_v20 = vld [vmem:[%s5373_s3 + $0x1d0] sm:$0xff] }
 0x12a   :  { %v4894_v16 = vpack.c.bf16 %v2673_v13, %v2672_v12  ;;  %v2741_v12 = vld [vmem:[%s5373_s3 + $0x2e8] sm:$0xff] }
 0x12b   :  { %4200 = vtanh.f32 %v778_v22  ;;  %v768_v25 = vmax.f32 %v762_v18, %v763_v24  ;;  %v636_v26 = vpop.f32.mrb[6].mxu0  ;;  %v745_v28 = vpop.f32.mrb[6].mxu1  ;;  %v803_v18 = vld [vmem:[%s5373_s3 + $0x50] sm:$0xff]  ;;  %v2675_v22 = vld [vmem:[%s5373_s3 + $0x1d8] sm:$0xff] }
 0x12c   :  { %v764_v30 = vmax.f32 %v636_v26, %v745_v28  ;;  %v638_v31 = vpop.f32.mrb[7].mxu0  ;;  %v747_v32 = vpop.f32.mrb[7].mxu1  ;;  %v4912_v24 = vpack.c.bf16 %v804_v19, %v803_v18  ;;  %v805_v26 = vld [vmem:[%s5373_s3 + $0x60] sm:$0xff]  ;;  %v806_v28 = vld [vmem:[%s5373_s3 + $0x68] sm:$0xff]  ;;  %v2727_v18 = vld [vmem:[%s5373_s3 + $0x178] sm:$0xff] }
 0x12d   :  { %v779_v34 = vadd.f32 %v2663_v4, %v768_v25  ;;  %v765_v36 = vmax.f32 %v638_v31, %v747_v32  ;;  %v4914_v25 = vpack.c.bf16 %v2675_v22, %v2674_v20  ;;  %v2677_v31 = vld [vmem:[%s5373_s3 + $0x1e8] sm:$0xff]  ;;  %v4932_v32 = vpack.c.bf16 %v806_v28, %v805_v26  ;;  %v2742_v19 = vld [vmem:[%s5373_s3 + $0x2f0] sm:$0xff]  ;;  %v2743_v20 = vld [vmem:[%s5373_s3 + $0x2f8] sm:$0xff] }
 0x12e   :  { %v1835_v28 = vld [vmem:[%s5375_s5] sm:$0xff] }
 0x12f   :  { %4202 = vtanh.f32 %v779_v34  ;;  %v769_v37 = vmax.f32 %v764_v30, %v765_v36  ;;  %v2676_v30 = vld [vmem:[%s5373_s3 + $0x1e0] sm:$0xff]  ;;  %v807_v36 = vld [vmem:[%s5373_s3 + $0x70] sm:$0xff] }
 0x130   :  { %v4934_v34 = vpack.c.bf16 %v2677_v31, %v2676_v30  ;;  %v1836_v30 = vld [vmem:[%s5375_s5 + $0x8] sm:$0xff]  ;;  %v2745_v31 = vld [vmem:[%s5375_s5 + $0x20] sm:$0xff] }
 0x131   :  { %v4199_v38 = vpop.eup %4198  ;;  %v780_v40 = vadd.f32 %v2663_v4, %v769_v37  ;;  %v799_v4 = vld [vmem:[%s5373_s3 + $0x30] sm:$0xff]  ;;  %v808_v37 = vld [vmem:[%s5373_s3 + $0x78] sm:$0xff] }
 0x132   :  { %789 = vst [vmem:[#allocation3 + $0x8] sm:$0xff] %v4199_v38  ;;  %v4872_v62 = vpack.c.bf16 %v800_v5, %v799_v4  ;;  %v2678_v38 = vld [vmem:[%s5373_s3 + $0x1f0] sm:$0xff]  ;;  %v2723_v4 = vld [vmem:[%s5373_s3 + $0x158] sm:$0xff] }
 0x133   :  { %4204 = vtanh.f32 %v780_v40  ;;  %v2679_v40 = vld [vmem:[%s5373_s3 + $0x1f8] sm:$0xff]  ;;  %v2738_v5 = vld [vmem:[%s5373_s3 + $0x2d0] sm:$0xff] }
 0x135   :  { %v4201_v42 = vpop.eup %4200 }
 0x136   :  { %790 = vst [vmem:[#allocation3 + $0x10] sm:$0xff] %v4201_v42  ;;  %v4952_v42 = vpack.c.bf16 %v808_v37, %v807_v36  ;;  %v2746_v36 = vld [vmem:[%s5375_s5 + $0x28] sm:$0xff]  ;;  %v1837_v37 = vld [vmem:[%s5375_s5 + $0x10] sm:$0xff] }
 0x139   :  { %v4203_v43 = vpop.eup %4202 }
 0x13a   :  { %791 = vst [vmem:[#allocation3 + $0x28] sm:$0xff] %v4203_v43  ;;  %v4954_v43 = vpack.c.bf16 %v2679_v40, %v2678_v38  ;;  %v1838_v38 = vld [vmem:[%s5375_s5 + $0x18] sm:$0xff]  ;;  %v4093_v40 = vpack.c.bf16 %v2746_v36, %v2745_v31  ;;  %v2767_v31 = vld [vmem:[%s5375_s5 + $0xa8] sm:$0xff] }
 0x13b   :  { %v2762_v36 = vld [vmem:[%s5375_s5 + $0x88] sm:$0xff] }
 0x13d   :  { %v4205_v44 = vpop.eup %4204  ;;  %v4812_v46 = vld [vmem:[#allocation3 + $0x8] ss:$2 sm:$0xff]  ;;  %v827_v1 = vld [vmem:[#allocation3 + $0x7] ss:$2 sm:$0xff] }
 0x13e   :  { %792 = vst [vmem:[#allocation3 + $0x30] sm:$0xff] %v4205_v44  ;;  %3077 = vmatprep.mubr.f32.mxu0 %v4812_v46  ;;  %3147 = vmatprep.mubr.f32.mxu1 %v4812_v46  ;;  %v4964_v48 = vld [vmem:[#allocation3 + $0x9] ss:$2 sm:$0xff] }
 0x145   :  { %v4834_v58 = vld [vmem:[#allocation3 + $0x28] ss:$2 sm:$0xff]  ;;  %v829_v44 = vld [vmem:[#allocation3 + $0x27] ss:$2 sm:$0xff] }
 0x146   :  { %3078 = vmatmul.mubr.f32.vlgmr.msra.gmra.mrb[8].mxu0 %v4834_v58  ;;  %3148 = vmatmul.mubr.f32.vlgmr.msra.gmra.mrb[8].mxu1 %v4834_v58  ;;  %v1663_v26 = vld [vmem:[#allocation3 + $0x2a] ss:$2 sm:$0xff] }
 0x147   :  { %3743 = vmatpush3.bf16.msra.mxu0 %v4793_v57  ;;  %3807 = vmatpush3.bf16.msra.mxu1 %v4802_v60 }
 0x148   :  { %3112 = vmatprep.mubr.f32.mxu0 %v827_v1  ;;  %3182 = vmatprep.mubr.f32.mxu1 %v827_v1 }
 0x149   :  { %3745 = vmatprep.subr.bf16.mxu0 %v4836_v59  ;;  %3809 = vmatprep.subr.bf16.mxu1 %v4838_v61 }
 0x14b   :  { %3747 = vmatpush3.bf16.msra.mxu0 %v4836_v59  ;;  %3811 = vmatpush3.bf16.msra.mxu1 %v4838_v61 }
 0x14c   :  { %3749 = vmatprep.subr.bf16.mxu0 %v4850_v2  ;;  %3813 = vmatprep.subr.bf16.mxu1 %v4852_v3 }
 0x14f   :  { %3751 = vmatpush3.bf16.msra.mxu0 %v4850_v2  ;;  %3815 = vmatpush3.bf16.msra.mxu1 %v4852_v3 }
 0x150   :  { %3753 = vmatprep.subr.bf16.mxu0 %v4872_v62  ;;  %3817 = vmatprep.subr.bf16.mxu1 %v4874_v6 }
 0x153   :  { %3755 = vmatpush3.bf16.msra.mxu0 %v4872_v62  ;;  %3819 = vmatpush3.bf16.msra.mxu1 %v4874_v6 }
 0x154   :  { %3757 = vmatprep.subr.bf16.mxu0 %v4892_v14  ;;  %3821 = vmatprep.subr.bf16.mxu1 %v4894_v16 }
 0x157   :  { %3759 = vmatpush3.bf16.msra.mxu0 %v4892_v14  ;;  %3823 = vmatpush3.bf16.msra.mxu1 %v4894_v16 }
 0x158   :  { %3761 = vmatprep.subr.bf16.mxu0 %v4912_v24  ;;  %3825 = vmatprep.subr.bf16.mxu1 %v4914_v25 }
 0x15b   :  { %3763 = vmatpush3.bf16.msra.mxu0 %v4912_v24  ;;  %3827 = vmatpush3.bf16.msra.mxu1 %v4914_v25 }
 0x15c   :  { %3765 = vmatprep.subr.bf16.mxu0 %v4932_v32  ;;  %3829 = vmatprep.subr.bf16.mxu1 %v4934_v34 }
 0x15f   :  { %3767 = vmatpush3.bf16.msra.mxu0 %v4932_v32  ;;  %3831 = vmatpush3.bf16.msra.mxu1 %v4934_v34 }
 0x160   :  { %3769 = vmatprep.subr.bf16.mxu0 %v4952_v42  ;;  %3833 = vmatprep.subr.bf16.mxu1 %v4954_v43 }
 0x163   :  { %3771 = vmatpush3.bf16.msra.mxu0 %v4952_v42  ;;  %3835 = vmatpush3.bf16.msra.mxu1 %v4954_v43 }
 0x164   :  { %3837 = vmatprep.subr.bf16.mxu0 %v4640_v10  ;;  %3901 = vmatprep.subr.bf16.mxu1 %v4645_v11 }
 0x166   :  { %3113 = vmatmul.mubr.f32.vlgmr.msra.gmra.mrb[8].mxu0 %v829_v44  ;;  %3183 = vmatmul.mubr.f32.vlgmr.msra.gmra.mrb[8].mxu1 %v829_v44  ;;  %v5212_v44 = vld [vmem:[#allocation3] sm:$0xff] }
 0x167   :  { %3839 = vmatpush3.bf16.msra.mxu0 %v4640_v10  ;;  %3217 = vmatprep.mubr.f32.mxu0 %v4964_v48  ;;  %v4999_v10 = vld [vmem:[#allocation3 + $0x29] ss:$2 sm:$0xff] }
 0x168   :  { %3903 = vmatpush3.bf16.msra.mxu1 %v4645_v11  ;;  %3287 = vmatprep.mubr.f32.mxu1 %v4964_v48  ;;  %v2712_v11 = vld [vmem:[%s5373_s3 + $0x100] sm:$0xff] }
 0x169   :  { %3841 = vmatprep.subr.bf16.mxu0 %v4660_v15  ;;  %3905 = vmatprep.subr.bf16.mxu1 %v4665_v17 }
 0x16b   :  { %3843 = vmatpush3.bf16.msra.mxu0 %v4660_v15  ;;  %v2713_v15 = vld [vmem:[%s5373_s3 + $0x108] sm:$0xff] }
 0x16c   :  { %3907 = vmatpush3.bf16.msra.mxu1 %v4665_v17  ;;  %3845 = vmatprep.subr.bf16.mxu0 %v4680_v21  ;;  %v2728_v17 = vld [vmem:[%s5373_s3 + $0x280] sm:$0xff] }
 0x16d   :  { %3909 = vmatprep.subr.bf16.mxu1 %v4685_v23 }
 0x16f   :  { %3847 = vmatpush3.bf16.msra.mxu0 %v4680_v21  ;;  %v2729_v21 = vld [vmem:[%s5373_s3 + $0x288] sm:$0xff] }
 0x170   :  { %3911 = vmatpush3.bf16.msra.mxu1 %v4685_v23  ;;  %3849 = vmatprep.subr.bf16.mxu0 %v4700_v27  ;;  %v5045_v23 = vpack.c.bf16 %v2713_v15, %v2712_v11 }
 0x171   :  { %3913 = vmatprep.subr.bf16.mxu1 %v4705_v29 }
 0x173   :  { %3851 = vmatpush3.bf16.msra.mxu0 %v4700_v27  ;;  %v5048_v27 = vpack.c.bf16 %v2729_v21, %v2728_v17 }
 0x174   :  { %3915 = vmatpush3.bf16.msra.mxu1 %v4705_v29  ;;  %3853 = vmatprep.subr.bf16.mxu0 %v4720_v33  ;;  %v2714_v29 = vld [vmem:[%s5373_s3 + $0x110] sm:$0xff] }
 0x175   :  { %3917 = vmatprep.subr.bf16.mxu1 %v4725_v35 }
 0x177   :  { %3855 = vmatpush3.bf16.msra.mxu0 %v4720_v33  ;;  %v2715_v33 = vld [vmem:[%s5373_s3 + $0x118] sm:$0xff] }
 0x178   :  { %3919 = vmatpush3.bf16.msra.mxu1 %v4725_v35  ;;  %3857 = vmatprep.subr.bf16.mxu0 %v4740_v39  ;;  %v2730_v35 = vld [vmem:[%s5373_s3 + $0x290] sm:$0xff] }
 0x179   :  { %3921 = vmatprep.subr.bf16.mxu1 %v4745_v41 }
 0x17b   :  { %3859 = vmatpush3.bf16.msra.mxu0 %v4740_v39  ;;  %v2731_v39 = vld [vmem:[%s5373_s3 + $0x298] sm:$0xff] }
 0x17c   :  { %3923 = vmatpush3.bf16.msra.mxu1 %v4745_v41  ;;  %3861 = vmatprep.subr.bf16.mxu0 %v4760_v45  ;;  %v5066_v41 = vpack.c.bf16 %v2715_v33, %v2714_v29 }
 0x17d   :  { %3925 = vmatprep.subr.bf16.mxu1 %v4765_v47 }
 0x17f   :  { %3863 = vmatpush3.bf16.msra.mxu0 %v4760_v45  ;;  %v2716_v45 = vld [vmem:[%s5373_s3 + $0x120] sm:$0xff] }
 0x180   :  { %3927 = vmatpush3.bf16.msra.mxu1 %v4765_v47  ;;  %3865 = vmatprep.subr.bf16.mxu0 %v4780_v51  ;;  %v2717_v47 = vld [vmem:[%s5373_s3 + $0x128] sm:$0xff] }
 0x181   :  { %3929 = vmatprep.subr.bf16.mxu1 %v4791_v56 }
 0x183   :  { %3867 = vmatpush3.bf16.msra.mxu0 %v4780_v51  ;;  %v5075_v51 = vpack.c.bf16 %v2731_v39, %v2730_v35 }
 0x184   :  { %3931 = vmatpush3.bf16.msra.mxu1 %v4791_v56  ;;  %3869 = vmatprep.subr.bf16.mxu0 %v4793_v57  ;;  %v2732_v56 = vld [vmem:[%s5373_s3 + $0x2a0] sm:$0xff] }
 0x185   :  { %3933 = vmatprep.subr.bf16.mxu1 %v4802_v60 }
 0x186   :  { %3218 = vmatmul.mubr.f32.vlgmr.msra.gmra.mrb[10].mxu0 %v4999_v10 }
 0x187   :  { %3288 = vmatmul.mubr.f32.vlgmr.msra.gmra.mrb[10].mxu1 %v4999_v10  ;;  %3871 = vmatpush3.bf16.msra.mxu0 %v4793_v57  ;;  %v2733_v57 = vld [vmem:[%s5373_s3 + $0x2a8] sm:$0xff] }
 0x188   :  { %3252 = vmatprep.mubr.f32.mxu0 %v4812_v46  ;;  %3935 = vmatpush3.bf16.msra.mxu1 %v4802_v60  ;;  %v5087_v60 = vpack.c.bf16 %v2717_v47, %v2716_v45  ;;  %v2744_v45 = vld [vmem:[%s5374_s4] ss:$0 sm:$0xff]  ;;  %s4240_s4 = smov [#allocation4]  }
 0x189   :  { %3322 = vmatprep.mubr.f32.mxu1 %v4812_v46  ;;  %3873 = vmatprep.subr.bf16.mxu0 %v4836_v59  ;;  %v5091_v46 = vpack.c.bf16 %v2733_v57, %v2732_v56  ;;  %s2583_s20 = sshll.u32 %s4240_s4, 4  ;;  %s2584_s20 = int_to_ptr.vmem [resolvable:$true] %s2583_s20 }
 0x18a   :  { %3937 = vmatprep.subr.bf16.mxu1 %v4838_v61  ;;  %p4218_p1 = scmp.lt.s32.totalorder %s2584_s20, %s2584_s20 }
 0x18b   :  { %3875 = vmatpush3.bf16.msra.mxu0 %v4836_v59  ;;  %v2720_v59 = vld [vmem:[%s5373_s3 + $0x140] sm:$0xff] }
 0x18c   :  { %3939 = vmatpush3.bf16.msra.mxu1 %v4838_v61  ;;  %3877 = vmatprep.subr.bf16.mxu0 %v4850_v2  ;;  %v2721_v61 = vld [vmem:[%s5373_s3 + $0x148] sm:$0xff] }
 0x18d   :  { %3941 = vmatprep.subr.bf16.mxu1 %v4852_v3  ;;  %v3980_v1 = vpack.c.bf16 %v2721_v61, %v2720_v59 }
 0x18f   :  { %3879 = vmatpush3.bf16.msra.mxu0 %v4850_v2  ;;  %v4012_v2 = vpack.c.bf16 %v2737_v0, %v2736_v63 }
 0x190   :  { %3943 = vmatpush3.bf16.msra.mxu1 %v4852_v3  ;;  %3881 = vmatprep.subr.bf16.mxu0 %v4872_v62  ;;  %v2722_v3 = vld [vmem:[%s5373_s3 + $0x150] sm:$0xff] }
 0x191   :  { %3945 = vmatprep.subr.bf16.mxu1 %v4874_v6  ;;  %v3984_v54 = vpack.c.bf16 %v2723_v4, %v2722_v3 }
 0x193   :  { %3883 = vmatpush3.bf16.msra.mxu0 %v4872_v62  ;;  %v4016_v62 = vpack.c.bf16 %v2739_v8, %v2738_v5 }
 0x194   :  { %3947 = vmatpush3.bf16.msra.mxu1 %v4874_v6  ;;  %3885 = vmatprep.subr.bf16.mxu0 %v4892_v14  ;;  %v2724_v6 = vld [vmem:[%s5373_s3 + $0x160] sm:$0xff] }
 0x195   :  { %3949 = vmatprep.subr.bf16.mxu1 %v4894_v16  ;;  %v3988_v13 = vpack.c.bf16 %v2725_v9, %v2724_v6  ;;  %v2753_v9 = vld [vmem:[%s5375_s5 + $0x50] sm:$0xff] }
 0x197   :  { %3887 = vmatpush3.bf16.msra.mxu0 %v4892_v14  ;;  %v4020_v14 = vpack.c.bf16 %v2741_v12, %v2740_v7  ;;  %v2754_v7 = vld [vmem:[%s5375_s5 + $0x58] sm:$0xff] }
 0x198   :  { %3951 = vmatpush3.bf16.msra.mxu1 %v4894_v16  ;;  %3889 = vmatprep.subr.bf16.mxu0 %v4912_v24  ;;  %v2726_v16 = vld [vmem:[%s5373_s3 + $0x170] sm:$0xff]  ;;  %s4213_s3 = scalar_lea.vmem %s2584_s20, 32 }
 0x199   :  { %3953 = vmatprep.subr.bf16.mxu1 %v4914_v25  ;;  %v3992_v22 = vpack.c.bf16 %v2727_v18, %v2726_v16  ;;  %p4214_p0 = scmp.ne.s32.totalorder %s2584_s20, %s4213_s3  ;;  %p4219_p2 = scmp.lt.s32.totalorder %s4213_s3, %s4213_s3 }
 0x19b   :  { %3891 = vmatpush3.bf16.msra.mxu0 %v4912_v24  ;;  %v4024_v24 = vpack.c.bf16 %v2743_v20, %v2742_v19  ;;  %p4220_p3 = por %p4219_p2, %p4218_p1 }
 0x19c   :  { %3955 = vmatpush3.bf16.msra.mxu1 %v4914_v25  ;;  %3893 = vmatprep.subr.bf16.mxu0 %v4932_v32  ;;  %v1661_v25 = vld [vmem:[#allocation3 + $0xa] ss:$2 sm:$0xff] }
 0x19d   :  { %3957 = vmatprep.subr.bf16.mxu1 %v4934_v34  ;;  %p4221_p4 = pnand %p4220_p3, %p4214_p0 }
 0x19f   :  { %3895 = vmatpush3.bf16.msra.mxu0 %v4932_v32  ;;  %v4238_v32 = vmov 0.0|0.0  }
 0x1a0   :  { %3959 = vmatpush3.bf16.msra.mxu1 %v4934_v34  ;;  %3897 = vmatprep.subr.bf16.mxu0 %v4952_v42  ;;  %v4099_v34 = vpack.c.bf16 %v1836_v30, %v1835_v28  ;;  %v4108_v28 = vpack.c.bf16 %v2754_v7, %v2753_v9  ;;  %v2766_v30 = vld [vmem:[%s5375_s5 + $0xa0] sm:$0xff] }
 0x1a1   :  { %3961 = vmatprep.subr.bf16.mxu1 %v4954_v43 }
 0x1a3   :  { %3899 = vmatpush3.bf16.msra.mxu0 %v4952_v42  ;;  %v2747_v42 = vld [vmem:[%s5375_s5 + $0x30] sm:$0xff] }
 0x1a4   :  { %3963 = vmatpush3.bf16.msra.mxu1 %v4954_v43  ;;  %3965 = vmatprep.subr.bf16.mxu0 %v5045_v23  ;;  %v2748_v43 = vld [vmem:[%s5375_s5 + $0x38] sm:$0xff] }
 0x1a5   :  { %3997 = vmatprep.subr.bf16.mxu1 %v5048_v27 }
 0x1a6   :  { %3253 = vmatmul.mubr.f32.vlgmr.msra.gmra.mrb[10].mxu0 %v4834_v58 }
 0x1a7   :  { %3323 = vmatmul.mubr.f32.vlgmr.msra.gmra.mrb[10].mxu1 %v4834_v58  ;;  %3967 = vmatpush3.bf16.msra.mxu0 %v5045_v23  ;;  %v5112_v58 = vpack.c.bf16 %v2735_v53, %v2734_v52  ;;  %v2752_v52 = vld [vmem:[%s5375_s5 + $0x48] sm:$0xff]  ;;  %v2758_v53 = vld [vmem:[%s5375_s5 + $0x70] sm:$0xff] }
 0x1a8   :  { %3357 = vmatprep.mubr.f32.mxu0 %v4964_v48  ;;  %3999 = vmatpush3.bf16.msra.mxu1 %v5048_v27  ;;  %v4105_v61 = vpack.c.bf16 %v2752_v52, %v2751_v50  ;;  %v2494_v50 = vld [vmem:[%s5377_s7 + $0x18] sm:$0xff] }
 0x1a9   :  { %3392 = vmatprep.mubr.f32.mxu1 %v4964_v48  ;;  %3969 = vmatprep.subr.bf16.mxu0 %v5066_v41  ;;  %v4102_v48 = vpack.c.bf16 %v1838_v38, %v1837_v37 }
 0x1aa   :  { %4001 = vmatprep.subr.bf16.mxu1 %v5075_v51 }
 0x1ab   :  { %3971 = vmatpush3.bf16.msra.mxu0 %v5066_v41 }
 0x1ac   :  { %4003 = vmatpush3.bf16.msra.mxu1 %v5075_v51  ;;  %3973 = vmatprep.subr.bf16.mxu0 %v5087_v60 }
 0x1ad   :  { %4005 = vmatprep.subr.bf16.mxu1 %v5091_v46 }
 0x1af   :  { %3975 = vmatpush3.bf16.msra.mxu0 %v5087_v60 }
 0x1b0   :  { %4007 = vmatpush3.bf16.msra.mxu1 %v5091_v46  ;;  %3977 = vmatprep.subr.bf16.mxu0 %v5109_v55 }
 0x1b1   :  { %4009 = vmatprep.subr.bf16.mxu1 %v5112_v58 }
 0x1b3   :  { %3979 = vmatpush3.bf16.msra.mxu0 %v5109_v55 }
 0x1b4   :  { %4011 = vmatpush3.bf16.msra.mxu1 %v5112_v58  ;;  %3981 = vmatprep.subr.bf16.mxu0 %v3980_v1 }
 0x1b5   :  { %4013 = vmatprep.subr.bf16.mxu1 %v4012_v2 }
 0x1b7   :  { %3983 = vmatpush3.bf16.msra.mxu0 %v3980_v1 }
 0x1b8   :  { %4015 = vmatpush3.bf16.msra.mxu1 %v4012_v2  ;;  %3985 = vmatprep.subr.bf16.mxu0 %v3984_v54 }
 0x1b9   :  { %4017 = vmatprep.subr.bf16.mxu1 %v4016_v62 }
 0x1bb   :  { %3987 = vmatpush3.bf16.msra.mxu0 %v3984_v54 }
 0x1bc   :  { %4019 = vmatpush3.bf16.msra.mxu1 %v4016_v62  ;;  %3989 = vmatprep.subr.bf16.mxu0 %v3988_v13 }
 0x1bd   :  { %4021 = vmatprep.subr.bf16.mxu1 %v4020_v14 }
 0x1bf   :  { %3991 = vmatpush3.bf16.msra.mxu0 %v3988_v13 }
 0x1c0   :  { %4023 = vmatpush3.bf16.msra.mxu1 %v4020_v14  ;;  %3993 = vmatprep.subr.bf16.mxu0 %v3992_v22 }
 0x1c1   :  { %4025 = vmatprep.subr.bf16.mxu1 %v4024_v24 }
 0x1c3   :  { %3995 = vmatpush3.bf16.msra.mxu0 %v3992_v22 }
 0x1c4   :  { %4027 = vmatpush3.bf16.msra.mxu1 %v4024_v24  ;;  %4029 = vmatprep.subr.bf16.mxu0 %v5045_v23 }
 0x1c5   :  { %4061 = vmatprep.subr.bf16.mxu1 %v5048_v27 }
 0x1c6   :  { %3358 = vmatmul.mubr.f32.vlgmr.msra.gmra.mrb[8].mxu0 %v4999_v10 }
 0x1c7   :  { %3393 = vmatmul.mubr.f32.vlgmr.msra.gmra.mrb[8].mxu1 %v4999_v10  ;;  %4031 = vmatpush3.bf16.msra.mxu0 %v5045_v23  ;;  %v4096_v10 = vpack.c.bf16 %v2748_v43, %v2747_v42  ;;  %v2768_v43 = vld [vmem:[%s5375_s5 + $0xb0] sm:$0xff] }
 0x1c8   :  { %3427 = vmatprep.mubr.f32.mxu0 %v1661_v25  ;;  %4063 = vmatpush3.bf16.msra.mxu1 %v5048_v27 }
 0x1c9   :  { %3462 = vmatprep.mubr.f32.mxu1 %v1661_v25  ;;  %4033 = vmatprep.subr.bf16.mxu0 %v5066_v41 }
 0x1ca   :  { %4065 = vmatprep.subr.bf16.mxu1 %v5075_v51 }
 0x1cb   :  { %4035 = vmatpush3.bf16.msra.mxu0 %v5066_v41 }
 0x1cc   :  { %4067 = vmatpush3.bf16.msra.mxu1 %v5075_v51  ;;  %4037 = vmatprep.subr.bf16.mxu0 %v5087_v60 }
 0x1cd   :  { %4069 = vmatprep.subr.bf16.mxu1 %v5091_v46 }
 0x1cf   :  { %4039 = vmatpush3.bf16.msra.mxu0 %v5087_v60 }
 0x1d0   :  { %4071 = vmatpush3.bf16.msra.mxu1 %v5091_v46  ;;  %4041 = vmatprep.subr.bf16.mxu0 %v5109_v55  ;;  %v2756_v46 = vld [vmem:[%s5375_s5 + $0x60] sm:$0xff] }
 0x1d1   :  { %4073 = vmatprep.subr.bf16.mxu1 %v5112_v58  ;;  %v4111_v59 = vpack.c.bf16 %v2757_v49, %v2756_v46  ;;  %v2493_v46 = vld [vmem:[%s5377_s7 + $0x10] sm:$0xff] }
 0x1d2   :  { %v4144_v52 = vpack.c.bf16 %v2494_v50, %v2493_v46 }
 0x1d3   :  { %4043 = vmatpush3.bf16.msra.mxu0 %v5109_v55  ;;  %v2759_v55 = vld [vmem:[%s5375_s5 + $0x78] sm:$0xff] }
 0x1d4   :  { %4075 = vmatpush3.bf16.msra.mxu1 %v5112_v58  ;;  %4045 = vmatprep.subr.bf16.mxu0 %v3980_v1  ;;  %v4114_v63 = vpack.c.bf16 %v2759_v55, %v2758_v53 }
 0x1d5   :  { %4077 = vmatprep.subr.bf16.mxu1 %v4012_v2 }
 0x1d7   :  { %4047 = vmatpush3.bf16.msra.mxu0 %v3980_v1 }
 0x1d8   :  { %4079 = vmatpush3.bf16.msra.mxu1 %v4012_v2  ;;  %4049 = vmatprep.subr.bf16.mxu0 %v3984_v54 }
 0x1d9   :  { %4081 = vmatprep.subr.bf16.mxu1 %v4016_v62 }
 0x1db   :  { %4051 = vmatpush3.bf16.msra.mxu0 %v3984_v54 }
 0x1dc   :  { %4083 = vmatpush3.bf16.msra.mxu1 %v4016_v62  ;;  %4053 = vmatprep.subr.bf16.mxu0 %v3988_v13 }
 0x1dd   :  { %4085 = vmatprep.subr.bf16.mxu1 %v4020_v14 }
 0x1df   :  { %4055 = vmatpush3.bf16.msra.mxu0 %v3988_v13 }
 0x1e0   :  { %4087 = vmatpush3.bf16.msra.mxu1 %v4020_v14  ;;  %4057 = vmatprep.subr.bf16.mxu0 %v3992_v22 }
 0x1e1   :  { %4089 = vmatprep.subr.bf16.mxu1 %v4024_v24 }
 0x1e3   :  { %4059 = vmatpush3.bf16.msra.mxu0 %v3992_v22 }
 0x1e4   :  { %4091 = vmatpush3.bf16.msra.mxu1 %v4024_v24  ;;  %4092 = vmatprep.subr.bf16.mxu0 %v4238_v32 }
 0x1e5   :  { %4098 = vmatprep.subr.bf16.mxu1 %v4238_v32 }
 0x1e6   :  { %3428 = vmatmul.mubr.f32.vlgmr.msra.gmra.mrb[10].mxu0 %v1663_v26 }
 0x1e7   :  { %3463 = vmatmul.mubr.f32.vlgmr.msra.gmra.mrb[10].mxu1 %v1663_v26  ;;  %3473 = vmatprep.mubr.msk.f32.mxu0 %vm4239_vm1, %v5212_v44 }
 0x1e8   :  { %3484 = vmatprep.mubr.msk.f32.mxu1 %vm4239_vm1, %v5212_v44  ;;  %4100 = vmatpush3.bf16.msra.mxu1 %v4099_v34  ;;  %v2761_v34 = vld [vmem:[%s5375_s5 + $0x80] sm:$0xff] }
 0x1e9   :  { %4094 = vmatpush3.bf16.msra.mxu0 %v4093_v40  ;;  %4101 = vmatprep.subr.bf16.mxu1 %v4238_v32  ;;  %v4123_v40 = vpack.c.bf16 %v2767_v31, %v2766_v30  ;;  %v4117_v42 = vpack.c.bf16 %v2762_v36, %v2761_v34 }
 0x1ea   :  { %4095 = vmatprep.subr.bf16.mxu0 %v4238_v32 }
 0x1ec   :  { %4103 = vmatpush3.bf16.msra.mxu1 %v4102_v48  ;;  %v2769_v48 = vld [vmem:[%s5375_s5 + $0xb8] sm:$0xff] }
 0x1ed   :  { %4097 = vmatpush3.bf16.msra.mxu0 %v4096_v10  ;;  %4110 = vmatprep.subr.bf16.mxu1 %v4238_v32  ;;  %v2763_v10 = vld [vmem:[%s5375_s5 + $0x90] sm:$0xff] }
 0x1ee   :  { %4104 = vmatprep.subr.bf16.mxu0 %v4238_v32 }
 0x299   :  { %v3359_v11 = vpop.f32.mrb[8].mxu0 }
 0x29a   :  { %v3394_v15 = vpop.f32.mrb[8].mxu1  ;;  %v1572_v17 = vpop.f32.mrb[9].mxu0 }
 0x29b   :  { %v1819_v21 = vmax.f32 %v3359_v11, %v3394_v15  ;;  %v1649_v23 = vpop.f32.mrb[9].mxu1  ;;  %v2764_v11 = vld [vmem:[%s5375_s5 + $0x98] sm:$0xff]  ;;  %v4126_v15 = vpack.c.bf16 %v2769_v48, %v2768_v43 }
 0x29c   :  { %v1818_v27 = vmax.f32 %v1572_v17, %v1649_v23  ;;  %v4120_v17 = vpack.c.bf16 %v2764_v11, %v2763_v10  ;;  %v2777_v23 = vld [vmem:[%s5375_s5 + $0xe8] sm:$0xff] }
 0x2b9   :  { %v3429_v29 = vpop.f32.mrb[10].mxu0 }
 0x2ba   :  { %v3464_v33 = vpop.f32.mrb[10].mxu1  ;;  %v1730_v35 = vpop.f32.mrb[11].mxu0 }
 0x2bb   :  { %v1821_v39 = vmax.f32 %v3429_v29, %v3464_v33  ;;  %v1807_v41 = vpop.f32.mrb[11].mxu1  ;;  %v2772_v29 = vld [vmem:[%s5375_s5 + $0xc8] sm:$0xff] }
 0x2bc   :  { %v1820_v47 = vmax.f32 %v1730_v35, %v1807_v41  ;;  %v2779_v41 = vld [vmem:[%s5375_s5 + $0xf8] sm:$0xff] }
 0x2bd   :  { %v1823_v51 = vmax.f32 %v1819_v21, %v1821_v39  ;;  %v2776_v21 = vld [vmem:[%s5375_s5 + $0xe0] sm:$0xff]  ;;  %v2778_v39 = vld [vmem:[%s5375_s5 + $0xf0] sm:$0xff] }
 0x2be   :  { %v1822_v56 = vmax.f32 %v1818_v27, %v1820_v47  ;;  %v2771_v27 = vld [vmem:[%s5375_s5 + $0xc0] sm:$0xff]  ;;  %v4135_v33 = vpack.c.bf16 %v2777_v23, %v2776_v21  ;;  %v2774_v47 = vld [vmem:[%s5375_s5 + $0xd8] sm:$0xff] }
 0x2bf   :  { %v1832_v57 = vadd.f32 %v2744_v45, %v1823_v51  ;;  %v4129_v35 = vpack.c.bf16 %v2772_v29, %v2771_v27  ;;  %v4138_v51 = vpack.c.bf16 %v2779_v41, %v2778_v39 }
 0x2c0   :  { %v1831_v60 = vadd.f32 %v2744_v45, %v1822_v56  ;;  %v2773_v45 = vld [vmem:[%s5375_s5 + $0xd0] sm:$0xff] }
 0x2c1   :  { %4206 = vtanh.f32 %v1832_v57  ;;  %v4132_v56 = vpack.c.bf16 %v2774_v47, %v2773_v45  ;;  %v2491_v57 = vld [vmem:[%s5377_s7] sm:$0xff] }
 0x2c2   :  { %4208 = vtanh.f32 %v1831_v60  ;;  %v2492_v60 = vld [vmem:[%s5377_s7 + $0x8] sm:$0xff] }
 0x2c3   :  { %v4141_v49 = vpack.c.bf16 %v2492_v60, %v2491_v57 }
 0x2cb   :  { %v4207_v58 = vpop.eup %4206 }
 0x2cc   :  { %v4209_v0 = vpop.eup %4208  ;;  %v1922_v1 = vrot.slane %v4207_v58, 7  ;;  %v2083_v2 = vrot.slane %v4207_v58, 2  ;;  %v2002_v3 = vrot.slane %v4207_v58, 1  ;;  %v2245_v4 = vrot.slane %v4207_v58, 4 }
 0x2cd   :  { %v1846_v5 = vrot.slane %v4209_v0, 1  ;;  %v2082_v8 = vrot.slane %v4209_v0, 3  ;;  %v2001_v54 = vrot.slane %v4209_v0, 2  ;;  %v2244_v62 = vrot.slane %v4209_v0, 5 }
 0x2ce   :  { %v1923_v6 = vsel %vm1847_vm2, %v1922_v1, %v4209_v0  ;;  %v2163_v12 = vrot.slane %v4209_v0, 4  ;;  %v2164_v13 = vrot.slane %v4207_v58, 3  ;;  %v2406_v14 = vrot.slane %v4209_v0, 7 }
 0x2cf   :  { %3485 = vmatmul.mubr.msk.f32.vlgmr.msra.gmra.mrb[12].mxu1 %vm1849_vm3, %v1923_v6  ;;  %v1848_v16 = vsel %vm1847_vm2, %v4207_v58, %v1846_v5  ;;  %v2084_v18 = vsel %vm1847_vm2, %v2083_v2, %v2082_v8  ;;  %v2003_v19 = vsel %vm1847_vm2, %v2002_v3, %v2001_v54  ;;  %v2246_v20 = vsel %vm1847_vm2, %v2245_v4, %v2244_v62 }
 0x2d0   :  { %4112 = vmatpush3.bf16.msra.mxu1 %v4111_v59  ;;  %3474 = vmatmul.mubr.msk.f32.vlgmr.msra.gmra.mrb[12].mxu0 %vm1849_vm3, %v1848_v16  ;;  %v2165_v22 = vsel %vm1847_vm2, %v2164_v13, %v2163_v12  ;;  %v2407_v24 = vrot.slane %v4207_v58, 6  ;;  %v2325_v25 = vrot.slane %v4209_v0, 6  ;;  %v2326_v26 = vrot.slane %v4207_v58, 5 }
 0x2d1   :  { %4106 = vmatpush3.bf16.msra.mxu0 %v4105_v61  ;;  %4113 = vmatprep.subr.bf16.mxu1 %v4238_v32 }
 0x2d2   :  { %4107 = vmatprep.subr.bf16.mxu0 %v4238_v32  ;;  %3506 = vmatprep.mubr.msk.f32.mxu1 %vm4239_vm1, %v5212_v44  ;;  %v2408_v37 = vsel %vm1847_vm2, %v2407_v24, %v2406_v14  ;;  %v2327_v38 = vsel %vm1847_vm2, %v2326_v26, %v2325_v25  ;;  %v2781_v14 = vld [vmem:[%s5376_s6] ss:$0 sm:$0xff] }
 0x2d3   :  { %3495 = vmatprep.mubr.msk.f32.mxu0 %vm4239_vm1, %v5212_v44 }
 0x2d4   :  { %4115 = vmatpush3.bf16.msra.mxu1 %v4114_v63 }
 0x2d5   :  { %4109 = vmatpush3.bf16.msra.mxu0 %v4108_v28  ;;  %4122 = vmatprep.subr.bf16.mxu1 %v4238_v32 }
 0x2d6   :  { %4116 = vmatprep.subr.bf16.mxu0 %v4238_v32 }
 0x2d7   :  { %3507 = vmatmul.mubr.msk.f32.vlgmr.msra.gmra.mrb[14].mxu1 %vm1849_vm3, %v2084_v18 }
 0x2d8   :  { %3496 = vmatmul.mubr.msk.f32.vlgmr.msra.gmra.mrb[14].mxu0 %vm1849_vm3, %v2003_v19  ;;  %4124 = vmatpush3.bf16.msra.mxu1 %v4123_v40 }
 0x2d9   :  { %4118 = vmatpush3.bf16.msra.mxu0 %v4117_v42  ;;  %4125 = vmatprep.subr.bf16.mxu1 %v4238_v32 }
 0x2da   :  { %4119 = vmatprep.subr.bf16.mxu0 %v4238_v32  ;;  %3528 = vmatprep.mubr.msk.f32.mxu1 %vm4239_vm1, %v5212_v44 }
 0x2db   :  { %3517 = vmatprep.mubr.msk.f32.mxu0 %vm4239_vm1, %v5212_v44 }
 0x2dc   :  { %4127 = vmatpush3.bf16.msra.mxu1 %v4126_v15 }
 0x2dd   :  { %4121 = vmatpush3.bf16.msra.mxu0 %v4120_v17  ;;  %4134 = vmatprep.subr.bf16.mxu1 %v4238_v32 }
 0x2de   :  { %4128 = vmatprep.subr.bf16.mxu0 %v4238_v32 }
 0x2df   :  { %3529 = vmatmul.mubr.msk.f32.vlgmr.msra.gmra.mrb[16].mxu1 %vm1849_vm3, %v2246_v20  ;;  %v2782_v20 = vld [vmem:[%s5378_s8] ss:$0 sm:$0xff] }
 0x2e0   :  { %3518 = vmatmul.mubr.msk.f32.vlgmr.msra.gmra.mrb[16].mxu0 %vm1849_vm3, %v2165_v22  ;;  %4136 = vmatpush3.bf16.msra.mxu1 %v4135_v33 }
 0x2e1   :  { %4130 = vmatpush3.bf16.msra.mxu0 %v4129_v35  ;;  %4137 = vmatprep.subr.bf16.mxu1 %v4238_v32 }
 0x2e2   :  { %4131 = vmatprep.subr.bf16.mxu0 %v4238_v32  ;;  %3550 = vmatprep.mubr.msk.f32.mxu1 %vm4239_vm1, %v5212_v44 }
 0x2e3   :  { %3539 = vmatprep.mubr.msk.f32.mxu0 %vm4239_vm1, %v5212_v44 }
 0x2e4   :  { %4139 = vmatpush3.bf16.msra.mxu1 %v4138_v51 }
 0x2e5   :  { %4133 = vmatpush3.bf16.msra.mxu0 %v4132_v56 }
 0x2e6   :  { %4140 = vmatprep.subr.bf16.mxu0 %v4238_v32 }
 0x2e7   :  { %3551 = vmatmul.mubr.msk.f32.vlgmr.msra.gmra.mrb[18].mxu1 %vm1849_vm3, %v2408_v37 }
 0x2e8   :  { %3540 = vmatmul.mubr.msk.f32.vlgmr.msra.gmra.mrb[18].mxu0 %vm1849_vm3, %v2327_v38 }
 0x2e9   :  { %3561 = vmatprep.mubr.msk.f32.mxu0 %vm4239_vm1, %v5212_v44  ;;  %4142 = vmatpush3.bf16.msra.mxu0 %v4141_v49 }
 0x2ea   :  { %4143 = vmatprep.subr.bf16.mxu0 %v4238_v32 }
 0x2ed   :  { %4145 = vmatpush3.bf16.msra.mxu0 %v4144_v52 }
 0x3a2   :  { %v1992_v44 = vpop.f32.mrb[12].mxu1 }
 0x3a3   :  { %v1918_v53 = vpop.f32.mrb[12].mxu0  ;;  %v3486_v55 = vpop.f32.mrb[13].mxu1 }
 0x3a4   :  { %v1993_v58 = vadd.f32 %v1992_v44, %v1918_v53  ;;  %v3475_v59 = vpop.f32.mrb[13].mxu0 }
 0x3aa   :  { %v2153_v61 = vpop.f32.mrb[14].mxu1 }
 0x3ab   :  { %v2072_v63 = vpop.f32.mrb[14].mxu0  ;;  %v3508_v0 = vpop.f32.mrb[15].mxu1 }
 0x3ac   :  { %v2076_v1 = vadd.f32 %v2072_v63, %v1993_v58  ;;  %v3497_v2 = vpop.f32.mrb[15].mxu0 }
 0x3ae   :  { %v2157_v3 = vadd.f32 %v2153_v61, %v2076_v1 }
 0x3b2   :  { %v2315_v4 = vpop.f32.mrb[16].mxu1 }
 0x3b3   :  { %v2234_v5 = vpop.f32.mrb[16].mxu0  ;;  %v3530_v8 = vpop.f32.mrb[17].mxu1 }
 0x3b4   :  { %v2238_v54 = vadd.f32 %v2234_v5, %v2157_v3  ;;  %v3519_v62 = vpop.f32.mrb[17].mxu0 }
 0x3b6   :  { %v2319_v6 = vadd.f32 %v2315_v4, %v2238_v54 }
 0x3ba   :  { %v2477_v9 = vpop.f32.mrb[18].mxu1 }
 0x3bb   :  { %v2396_v32 = vpop.f32.mrb[18].mxu0  ;;  %v3552_v7 = vpop.f32.mrb[19].mxu1 }
 0x3bc   :  { %v2400_v12 = vadd.f32 %v2396_v32, %v2319_v6  ;;  %v3541_v13 = vpop.f32.mrb[19].mxu0 }
 0x3be   :  { %v2481_v16 = vadd.f32 %v2477_v9, %v2400_v12 }
 0x3c0   :  { %v2489_v18 = vadd.f32 %v2781_v14, %v2481_v16 }
 0x3c2   :  { %4210 = vtanh.f32 %v2489_v18 }
 0x3cc   :  { %v4211_v19 = vpop.eup %4210 }
 0x3cd   :  { %3562 = vmatmul.mubr.msk.f32.vlgmr.msra.gmra.mrb[20].mxu0 %vm1849_vm3, %v4211_v19 }
 0x4a0   :  { %v2571_v22 = vpop.f32.mrb[20].mxu0 }
 0x4a1   :  { %v2572_v24 = vadd.f32 %v2782_v20, %v2571_v22  ;;  %v3563_v25 = vpop.f32.mrb[21].mxu0 }
 0x4a3   :  { %2576 = vst.msk [vmem:[#allocation4] sm:$0x3] %vm2575_vm4, %v2572_v24 }
 0x4a4   :  { %4224 = shalt.err (!%p4221_p4)
}
 0x4a5   :  { %s4225_s21 = scalar_lea.hbm %s5379_s9, 32 }
 0x4a6   :  { %p4226_p5 = scmp.ne.s32.totalorder %s5379_s9, %s4225_s21  ;;  %p4229_p6 = scmp.lt.u32.totalorder %s4225_s21, %s5379_s9 }
 0x4a8   :  { %p4231_p7 = pnand %p4229_p6, %p4226_p5 }
 0x4aa   :  { %4234 = shalt.err (!%p4231_p7)
}
 0x4ab   :  { %2586 = dma.vmem_to_hbm [thread:$0]  %s2584_s20, 32, %s5379_s9, [#allocation5]  }
 0x4ac   :  { %4235 = dma.done.wait [#allocation5], 32  }
 0x4ad   :  { %4236 = vsyncadd [#allocation5], 4294967264 }
 0x4ae   :  { %2590 = vsyncpa [#allocation5], 1 }

</bundles_post_ra>
